<compile_context>
chip_gen: v7x
topology: tpu7x:2x2x1
jax: 0.10.0
libtpu: 0.0.40
codegen_flags: <defaults>
</compile_context>

<pallas_src>
import functools
import math

import jax
import jax.numpy as jnp
from jax import lax
from jax.experimental import pallas as pl
from jax.experimental.pallas import tpu as pltpu

_MASK_VALUE = -0.7 * float(jnp.finfo(jnp.float32).max)
_VMEM_LIMIT = 32 * 1024 * 1024  # safe on v5e/v6e (128 MiB) and v7x (64 MiB physical)


def _tile(n, target, align):
    """Tile size for an axis of extent n: n itself if n <= target, otherwise the
    largest divisor of n that is <= target and a multiple of `align`."""
    if n <= target:
        return n
    t = (target // align) * align
    for d in range(t, 0, -align):
        if n % d == 0:
            return d
    # TODO(synk): pad awkward extents to an aligned size instead of falling back
    # to one full-extent block.
    return n


# ---------------------------------------------------------------------------
# Tiled linear kernel: y = x @ W + b   (W stored as (in, out) = torch W.T)
# ---------------------------------------------------------------------------
def _linear_kernel(x_ref, w_ref, b_ref, o_ref, acc_ref):
    @pl.when(pl.program_id(2) == 0)
    def _():
        acc_ref[...] = jnp.zeros(acc_ref.shape, acc_ref.dtype)

    # Operands stay in the input dtype (bf16 inputs -> bf16 MXU), f32 accumulate.
    acc_ref[...] += jnp.dot(x_ref[...], w_ref[...],
                            preferred_element_type=jnp.float32)

    @pl.when(pl.program_id(2) == pl.num_programs(2) - 1)
    def _():
        o_ref[...] = (acc_ref[...] + b_ref[...].astype(jnp.float32)).astype(o_ref.dtype)


def linear(x2d, w, b, *, tm=256, tn=256, tk=512):
    M, K = x2d.shape
    Kw, N = w.shape
    assert Kw == K and b.shape == (N,)
    tm = _tile(M, tm, 8)
    tn = _tile(N, tn, 128)
    tk = _tile(K, tk, 128)
    # Grid ordered (col-tile, row-tile, k): for fixed output columns the weight
    # block index is independent of the row tile, so it stays resident in VMEM
    # instead of being re-streamed M/tm times.
    grid = (N // tn, M // tm, K // tk)
    itemsize = jnp.dtype(x2d.dtype).itemsize
    return pl.pallas_call(
        _linear_kernel,
        out_shape=jax.ShapeDtypeStruct((M, N), x2d.dtype),
        grid_spec=pltpu.PrefetchScalarGridSpec(
            num_scalar_prefetch=0,
            grid=grid,
            in_specs=[
                pl.BlockSpec((tm, tk), lambda j, i, k: (i, k)),
                pl.BlockSpec((tk, tn), lambda j, i, k: (k, j)),
                pl.BlockSpec((1, tn), lambda j, i, k: (0, j)),
            ],
            out_specs=pl.BlockSpec((tm, tn), lambda j, i, k: (i, j)),
            scratch_shapes=[pltpu.VMEM((tm, tn), jnp.float32)],
        ),
        compiler_params=pltpu.CompilerParams(
            dimension_semantics=("parallel", "parallel", "arbitrary"),
            vmem_limit_bytes=_VMEM_LIMIT,
        ),
        cost_estimate=pl.CostEstimate(
            flops=2 * M * N * K,
            transcendentals=0,
            bytes_accessed=(M * K + K * N + N + M * N) * itemsize,
        ),
    )(x2d, w, b.reshape(1, N))


# ---------------------------------------------------------------------------
# Flash attention kernel (fused RoPE + softcap + causal mask + online softmax)
# Consumes the fused QKV slab in (B, T, (H+2G)*hs) layout, emits (B, T, H*hs).
# ---------------------------------------------------------------------------
def _flash_kernel(q_ref, k_ref, v_ref, cq_ref, sq_ref, ck_ref, sk_ref,
                  o_ref, q_sc, m_sc, l_sc, acc_sc, *,
                  scale, causal, softcap, use_rope,
                  n_head, n_query_groups, head_size, tq, tk):
    qi = pl.program_id(1)
    ki = pl.program_id(2)
    H, G, hs = n_head, n_query_groups, head_size
    rep = H // G
    half = hs // 2
    dot_dtype = q_ref.dtype

    def rope(x_f32, cos, sin):
        # split-halves rotation: x*[c,c] + [x_hi, x_lo]*[-s,s]
        rot = jnp.concatenate([x_f32[:, half:], x_f32[:, :half]], axis=1)
        return x_f32 * cos + rot * sin

    @pl.when(ki == 0)
    def _init():
        m_sc[...] = jnp.full(m_sc.shape, _MASK_VALUE, m_sc.dtype)
        l_sc[...] = jnp.zeros(l_sc.shape, l_sc.dtype)
        acc_sc[...] = jnp.zeros(acc_sc.shape, acc_sc.dtype)
        # RoPE the q tile ONCE per q tile (hoisted out of the kv loop) into a
        # per-head VMEM scratch, stored in the dot dtype (bf16 stays bf16).
        q_blk = q_ref[0]                                     # (tq, H*hs)
        for h in range(H):
            q_h = q_blk[:, h * hs:(h + 1) * hs]
            if use_rope:
                q_h = rope(q_h.astype(jnp.float32), cq_ref[...], sq_ref[...])
                q_h = q_h.astype(dot_dtype)
            q_sc[h] = q_h

    def process(apply_mask):
        if apply_mask:
            q_pos = qi * tq + lax.broadcasted_iota(jnp.int32, (tq, tk), 0)
            k_pos = ki * tk + lax.broadcasted_iota(jnp.int32, (tq, tk), 1)
            visible = q_pos >= k_pos
        k_blk = k_ref[0]                                     # (tk, G*hs)
        v_blk = v_ref[0]
        # TODO(synk): k-RoPE is still recomputed once per q tile; it could be
        # fused into the QKV-linear epilogue to remove that redundancy too.
        for g in range(G):
            k_g = k_blk[:, g * hs:(g + 1) * hs]
            if use_rope:
                k_g = rope(k_g.astype(jnp.float32), ck_ref[...], sk_ref[...])
                k_g = k_g.astype(dot_dtype)
            v_g = v_blk[:, g * hs:(g + 1) * hs]
            for r in range(rep):                             # GQA: rep q heads / group
                h = g * rep + r
                s = lax.dot_general(q_sc[h], k_g, (((1,), (1,)), ((), ())),
                                    preferred_element_type=jnp.float32) * scale
                if softcap is not None:
                    s = jnp.tanh(s * (1.0 / softcap)) * softcap
                if apply_mask:
                    s = jnp.where(visible, s, _MASK_VALUE)
                m_prev = m_sc[h]                             # (tq, 1)
                m_new = jnp.maximum(m_prev, jnp.max(s, axis=-1, keepdims=True))
                alpha = jnp.exp(m_prev - m_new)
                p = jnp.exp(s - m_new)
                if apply_mask:
                    # keep fully-masked rows at l == 0 / acc == 0
                    p = jnp.where(visible, p, 0.0)
                l_sc[h] = alpha * l_sc[h] + jnp.sum(p, axis=-1, keepdims=True)
                acc_sc[h] = alpha * acc_sc[h] + jnp.dot(
                    p.astype(v_g.dtype), v_g, preferred_element_type=jnp.float32)
                m_sc[h] = m_new

    if causal:
        q_lo = qi * tq
        q_hi = q_lo + (tq - 1)
        k_lo = ki * tk
        k_hi = k_lo + (tk - 1)

        @pl.when(k_hi <= q_lo)                 # fully visible tile: no mask work
        def _():
            process(False)

        @pl.when(jnp.logical_and(k_hi > q_lo, k_lo <= q_hi))   # diagonal tile
        def _():
            process(True)
        # tiles with k_lo > q_hi are fully masked: compute is skipped and the
        # clamped index_map re-uses the previous K/V block so no DMA is issued.
    else:
        process(False)

    @pl.when(ki == pl.num_programs(2) - 1)
    def _finish():
        outs = []
        for h in range(H):
            # NOTE: on hardware this divide could become
            # acc * pl.reciprocal(l, approx=True) to route it to the EUP.
            outs.append(acc_sc[h] / l_sc[h])
        # single lane-dense (tq, H*hs) store
        o_ref[0] = jnp.concatenate(outs, axis=-1).astype(o_ref.dtype)


def flash_attention(qkv, cos_t, sin_t, *, n_head, n_query_groups, head_size,
                    scale, causal=True, softcap=None, use_rope=True,
                    tq=256, tk=256):
    """qkv: (B, T, (H + 2G) * hs) fused projection output (q/k columns already in
    split-halves order when use_rope).  Returns y of shape (B, T, H * hs)."""
    B, T, W = qkv.shape
    H, G, hs = n_head, n_query_groups, head_size
    rep = H // G
    q_w, kv_w = H * hs, G * hs
    assert W == q_w + 2 * kv_w
    # TODO(synk): pad head blocks when (G*hs) % 128 != 0 (e.g. MQA with hs=64).
    assert q_w % 128 == 0 and kv_w % 128 == 0, "head blocks must be lane-aligned"

    tq = _tile(T, tq, 8)
    tk = _tile(T, tk, 8)
    nq, nk = T // tq, T // tk

    if causal:
        def kv_idx(i, j):
            # Clamp so fully-masked kv tiles re-use the previous block (no DMA).
            return jnp.minimum(j, (i * tq + tq - 1) // tk)
    else:
        def kv_idx(i, j):
            return j

    kernel = functools.partial(
        _flash_kernel, scale=scale, causal=causal, softcap=softcap,
        use_rope=use_rope, n_head=H, n_query_groups=G, head_size=hs,
        tq=tq, tk=tk)

    itemsize = jnp.dtype(qkv.dtype).itemsize
    causal_div = 2 if causal else 1
    # NOTE: if DMA latency for the K/V blocks is exposed on v5e/v6e, add
    # pipeline_mode=pl.Buffered(3) to the K/V BlockSpecs (VMEM is plentiful there).
    return pl.pallas_call(
        kernel,
        out_shape=jax.ShapeDtypeStruct((B, T, q_w), qkv.dtype),
        grid_spec=pltpu.PrefetchScalarGridSpec(
            num_scalar_prefetch=0,
            grid=(B, nq, nk),
            in_specs=[
                pl.BlockSpec((1, tq, q_w), lambda b, i, j: (b, i, 0)),
                pl.BlockSpec((1, tk, kv_w), lambda b, i, j: (b, kv_idx(i, j), rep)),
                pl.BlockSpec((1, tk, kv_w), lambda b, i, j: (b, kv_idx(i, j), rep + 1)),
                pl.BlockSpec((tq, hs), lambda b, i, j: (i, 0)),            # cos @ q rows
                pl.BlockSpec((tq, hs), lambda b, i, j: (i, 0)),            # sin @ q rows
                pl.BlockSpec((tk, hs), lambda b, i, j: (kv_idx(i, j), 0)),  # cos @ k rows
                pl.BlockSpec((tk, hs), lambda b, i, j: (kv_idx(i, j), 0)),  # sin @ k rows
            ],
            out_specs=pl.BlockSpec((1, tq, q_w), lambda b, i, j: (b, i, 0)),
            scratch_shapes=[
                pltpu.VMEM((H, tq, hs), qkv.dtype),    # RoPE'd q (per head)
                pltpu.VMEM((H, tq, 1), jnp.float32),   # running max
                pltpu.VMEM((H, tq, 1), jnp.float32),   # running denominator
                pltpu.VMEM((H, tq, hs), jnp.float32),  # output accumulator
            ],
        ),
        compiler_params=pltpu.CompilerParams(
            dimension_semantics=("parallel", "parallel", "arbitrary"),
            vmem_limit_bytes=_VMEM_LIMIT,
        ),
        cost_estimate=pl.CostEstimate(
            flops=4 * B * H * T * T * hs // causal_div,
            transcendentals=B * H * T * T // causal_div,
            bytes_accessed=(B * T * (W + q_w) + 4 * T * hs) * itemsize,
        ),
    )(qkv, qkv, qkv, cos_t, sin_t, cos_t, sin_t)


# ---------------------------------------------------------------------------
# RoPE tables & weight preprocessing
# ---------------------------------------------------------------------------
def _rope_tables(T, head_size, base=10000.0):
    # TODO(synk): llama3-style rope_scaling (extra_config) not implemented.
    half = head_size // 2
    idx = jnp.arange(half, dtype=jnp.float32)
    inv_freq = 1.0 / (base ** (2.0 * idx / head_size))
    freqs = jnp.outer(jnp.arange(T, dtype=jnp.float32), inv_freq)   # (T, half)
    cos, sin = jnp.cos(freqs), jnp.sin(freqs)
    # split-halves form with the sign of sin folded in:
    #   rope(x) = x * cos_t + rot_half(x) * sin_t
    cos_t = jnp.concatenate([cos, cos], axis=-1)      # (T, hs)
    sin_t = jnp.concatenate([-sin, sin], axis=-1)     # (T, hs)
    return cos_t, sin_t


def _permute_qk_cols(qkv_w, qkv_b, n_head, n_query_groups, head_size):
    """Reorder q/k output columns of the fused QKV weight/bias so each head's
    features are laid out [even pair-indices..., odd pair-indices...]."""
    q_size = n_head * head_size
    k_size = n_query_groups * head_size
    perm = jnp.concatenate([jnp.arange(0, head_size, 2),
                            jnp.arange(1, head_size, 2)])

    def perm_block(a, nh):
        shp = a.shape
        a = a.reshape(shp[:-1] + (nh, head_size))[..., perm]
        return a.reshape(shp)

    w_q = perm_block(qkv_w[:, :q_size], n_head)
    w_k = perm_block(qkv_w[:, q_size:q_size + k_size], n_query_groups)
    w_v = qkv_w[:, q_size + k_size:]
    b_q = perm_block(qkv_b[:q_size], n_head)
    b_k = perm_block(qkv_b[q_size:q_size + k_size], n_query_groups)
    b_v = qkv_b[q_size + k_size:]
    return (jnp.concatenate([w_q, w_k, w_v], axis=1),
            jnp.concatenate([b_q, b_k, b_v], axis=0))


# ---------------------------------------------------------------------------
# Full CausalSelfAttention forward
# ---------------------------------------------------------------------------
def causal_self_attention(x, qkv_w, qkv_b, proj_w, proj_b, *,
                          n_head, n_query_groups, head_size,
                          use_rope=True, causal=True, softcap=None,
                          rope_base=10000.0, tq=256, tk=256):
    """x: (B, T, n_embd); qkv_w: (n_embd, (n_head+2*G)*hs); proj_w: (n_head*hs, n_embd)."""
    # TODO(synk): config.norm_qk (q/k normalization) and user-supplied masks are
    # not implemented (gpt2-small uses neither).
    B, T, C = x.shape
    assert head_size % 2 == 0

    if use_rope:
        qkv_w, qkv_b = _permute_qk_cols(qkv_w, qkv_b, n_head,
                                        n_query_groups, head_size)

    qkv = linear(x.reshape(B * T, C), qkv_w, qkv_b)           # (B*T, (H+2G)*hs)
    qkv = qkv.reshape(B, T, qkv.shape[-1])                    # free reshape, no transpose

    cos_t, sin_t = _rope_tables(T, head_size, rope_base)
    y = flash_attention(
        qkv, cos_t, sin_t, n_head=n_head, n_query_groups=n_query_groups,
        head_size=head_size, scale=1.0 / math.sqrt(head_size),
        causal=causal, softcap=softcap, use_rope=use_rope, tq=tq, tk=tk)

    out = linear(y.reshape(B * T, n_head * head_size), proj_w, proj_b)
    return out.reshape(B, T, C)


# ---------------------------------------------------------------------------
# Pure-JAX reference mirroring the PyTorch forward (interleaved RoPE)
# ---------------------------------------------------------------------------
def _reference_rope(x, cos, sin):
    B, H, T, hs = x.shape
    xr = x.astype(jnp.float32).reshape(B, H, T, hs // 2, 2)
    x0, x1 = xr[..., 0], xr[..., 1]
    c, s = cos[None, None], sin[None, None]
    out = jnp.stack([x0 * c - x1 * s, x0 * s + x1 * c], axis=-1)
    return out.reshape(B, H, T, hs).astype(x.dtype)


def reference_causal_self_attention(x, qkv_w, qkv_b, proj_w, proj_b, *,
                                    n_head, n_query_groups, head_size,
                                    use_rope=True, causal=True, softcap=None,
                                    rope_base=10000.0):
    B, T, C = x.shape
    qkv = x @ qkv_w + qkv_b
    q_size = n_head * head_size
    k_size = n_query_groups * head_size
    q, k, v = jnp.split(qkv, [q_size, q_size + k_size], axis=-1)
    q = q.reshape(B, T, n_head, head_size).transpose(0, 2, 1, 3)
    k = k.reshape(B, T, n_query_groups, head_size).transpose(0, 2, 1, 3)
    v = v.reshape(B, T, n_query_groups, head_size).transpose(0, 2, 1, 3)
    if use_rope:
        half = head_size // 2
        inv_freq = 1.0 / (rope_base ** (2.0 * jnp.arange(half, dtype=jnp.float32)
                                        / head_size))
        freqs = jnp.outer(jnp.arange(T, dtype=jnp.float32), inv_freq)
        cos, sin = jnp.cos(freqs), jnp.sin(freqs)
        q = _reference_rope(q, cos, sin)
        k = _reference_rope(k, cos, sin)
    if n_query_groups != n_head:
        rep = n_head // n_query_groups
        k = jnp.repeat(k, rep, axis=1)     # == torch repeat_interleave on dim 1
        v = jnp.repeat(v, rep, axis=1)
    scale = 1.0 / math.sqrt(head_size)
    s = jnp.einsum("bhqd,bhkd->bhqk", q, k).astype(jnp.float32) * scale
    if softcap is not None:
        s = jnp.tanh(s / softcap) * softcap
    if causal:
        mask = jnp.triu(jnp.ones((T, T), dtype=bool), k=1)
        s = jnp.where(mask[None, None], -jnp.inf, s)
    p = jax.nn.softmax(s, axis=-1).astype(q.dtype)
    y = jnp.einsum("bhqk,bhkd->bhqd", p, v)
    y = y.transpose(0, 2, 1, 3).reshape(B, T, n_head * head_size)
    return y @ proj_w + proj_b


# ---------------------------------------------------------------------------
# Demo / correctness checks
# ---------------------------------------------------------------------------
def _make_params(key, n_embd, n_head, n_query_groups, head_size, dtype):
    qkv_out = (n_head + 2 * n_query_groups) * head_size
    k1, k2, k3, k4 = jax.random.split(key, 4)
    s1 = 1.0 / math.sqrt(n_embd)
    s2 = 1.0 / math.sqrt(n_head * head_size)
    qkv_w = jax.random.uniform(k1, (n_embd, qkv_out), jnp.float32, -s1, s1).astype(dtype)
    qkv_b = jax.random.uniform(k2, (qkv_out,), jnp.float32, -s1, s1).astype(dtype)
    proj_w = jax.random.uniform(k3, (n_head * head_size, n_embd), jnp.float32,
                                -s2, s2).astype(dtype)
    proj_b = jax.random.uniform(k4, (n_embd,), jnp.float32, -s2, s2).astype(dtype)
    return qkv_w, qkv_b, proj_w, proj_b


if __name__ == "__main__":
    # gpt2-small-style mini config: n_embd=256, head_size=64, T=256.
    B, T, E = 2, 256, 256
    head_size = 64
    key = jax.random.PRNGKey(0)
    kx, kp = jax.random.split(key)
    x_f32 = jax.random.normal(kx, (B, T, E), jnp.float32)

    cases = [
        # (name,            H, G, dtype,        softcap, tq,  tk,  tol)
        ("mha_f32_nocap",   4, 4, jnp.float32,  None,    256, 256, 3e-3),
        ("mha_f32_softcap", 4, 4, jnp.float32,  30.0,    128, 128, 3e-3),
        ("gqa_f32",         4, 2, jnp.float32,  None,    128, 128, 3e-3),
        ("mha_bf16",        4, 4, jnp.bfloat16, None,    128, 128, 5e-2),
    ]
    for name, H, G, dtype, softcap, tq, tk, tol in cases:
        qkv_w, qkv_b, proj_w, proj_b = _make_params(kp, E, H, G, head_size, dtype)
        x = x_f32.astype(dtype)
        out = causal_self_attention(
            x, qkv_w, qkv_b, proj_w, proj_b,
            n_head=H, n_query_groups=G, head_size=head_size,
            use_rope=True, causal=True, softcap=softcap, tq=tq, tk=tk)
        out = jax.block_until_ready(out)
        ref = reference_causal_self_attention(
            x, qkv_w, qkv_b, proj_w, proj_b,
            n_head=H, n_query_groups=G, head_size=head_size,
            use_rope=True, causal=True, softcap=softcap)
        assert out.shape == (B, T, E)
        out32 = out.astype(jnp.float32)
        ref32 = ref.astype(jnp.float32)
        err = float(jnp.max(jnp.abs(out32 - ref32)))
        assert jnp.allclose(out32, ref32, atol=tol, rtol=tol), f"{name}: max err {err}"

    print("KERNEL_OK")
</pallas_src>

<mosaic_0001>
module attributes {stable_mosaic.version = 11 : i64} {
  func.func @_linear_kernel(%arg0: i32, %arg1: i32, %arg2: i32, %arg3: memref<256x256xf32, #tpu.memory_space<vmem>>, %arg4: memref<256x256xf32, #tpu.memory_space<vmem>>, %arg5: memref<1x256xf32, #tpu.memory_space<vmem>>, %arg6: memref<256x256xf32, #tpu.memory_space<vmem>>, %arg7: memref<256x256xf32, #tpu.memory_space<vmem>>) attributes {dimension_semantics = [#tpu.dimension_semantics<parallel>, #tpu.dimension_semantics<parallel>, #tpu.dimension_semantics<arbitrary>], iteration_bounds = array<i64: 3, 2, 1>, scalar_prefetch = 0 : i64, scratch_operands = 1 : i64, tpu.core_type = #tpu.core_type<tc>, window_params = [{transform_indices = @transform_0, window_bounds = array<i64: 256, 256>}, {transform_indices = @transform_1, window_bounds = array<i64: 256, 256>}, {transform_indices = @transform_2, window_bounds = array<i64: 1, 256>}, {transform_indices = @transform_3, window_bounds = array<i64: 256, 256>}]} {
    %c0_i32 = arith.constant 0 : i32
    %0 = arith.cmpi eq, %arg2, %c0_i32 : i32
    %1 = arith.extui %0 : i1 to i32
    %c0_i32_0 = arith.constant 0 : i32
    %2 = arith.cmpi ne, %1, %c0_i32_0 : i32
    scf.if %2 {
      %cst_10 = arith.constant 0.000000e+00 : f32
      %12 = vector.broadcast %cst_10 : f32 to vector<256x256xf32>
      %c0_11 = arith.constant 0 : index
      %c0_12 = arith.constant 0 : index
      %13 = vector.load %arg7[%c0_11, %c0_12] : memref<256x256xf32, #tpu.memory_space<vmem>>, vector<256x256xf32>
      tpu.vector_store %arg7[%c0_11, %c0_12], %12 {strides = array<i32>} : memref<256x256xf32, #tpu.memory_space<vmem>>, vector<256x256xf32>,
    } else {
    }
    %c0 = arith.constant 0 : index
    %c0_1 = arith.constant 0 : index
    %3 = vector.load %arg7[%c0, %c0_1] : memref<256x256xf32, #tpu.memory_space<vmem>>, vector<256x256xf32>
    %c0_2 = arith.constant 0 : index
    %c0_3 = arith.constant 0 : index
    %4 = vector.load %arg3[%c0_2, %c0_3] : memref<256x256xf32, #tpu.memory_space<vmem>>, vector<256x256xf32>
    %c0_4 = arith.constant 0 : index
    %c0_5 = arith.constant 0 : index
    %5 = vector.load %arg4[%c0_4, %c0_5] : memref<256x256xf32, #tpu.memory_space<vmem>>, vector<256x256xf32>
    %cst = arith.constant dense<0.000000e+00> : vector<256x256xf32>
    %6 = tpu.matmul %4, %5, %cst {dimension_numbers = #tpu.dot_dimension_numbers<[1], [0], [0], [1], [0, 0, 1, 1], [], []>} : vector<256x256xf32>, vector<256x256xf32>, vector<256x256xf32> -> vector<256x256xf32>
    %7 = arith.addf %3, %6 : vector<256x256xf32>
    %c0_6 = arith.constant 0 : index
    %c0_7 = arith.constant 0 : index
    %8 = vector.load %arg7[%c0_6, %c0_7] : memref<256x256xf32, #tpu.memory_space<vmem>>, vector<256x256xf32>
    tpu.vector_store %arg7[%c0_6, %c0_7], %7 {strides = array<i32>} : memref<256x256xf32, #tpu.memory_space<vmem>>, vector<256x256xf32>,
    %c0_i32_8 = arith.constant 0 : i32
    %9 = arith.cmpi eq, %arg2, %c0_i32_8 : i32
    %10 = arith.extui %9 : i1 to i32
    %c0_i32_9 = arith.constant 0 : i32
    %11 = arith.cmpi ne, %10, %c0_i32_9 : i32
    scf.if %11 {
      %c0_10 = arith.constant 0 : index
      %c0_11 = arith.constant 0 : index
      %12 = vector.load %arg7[%c0_10, %c0_11] : memref<256x256xf32, #tpu.memory_space<vmem>>, vector<256x256xf32>
      %c0_12 = arith.constant 0 : index
      %c0_13 = arith.constant 0 : index
      %13 = vector.load %arg5[%c0_12, %c0_13] : memref<1x256xf32, #tpu.memory_space<vmem>>, vector<1x256xf32>
      %14 = vector.broadcast %13 : vector<1x256xf32> to vector<256x256xf32>
      %15 = arith.addf %12, %14 : vector<256x256xf32>
      %c0_14 = arith.constant 0 : index
      %c0_15 = arith.constant 0 : index
      %16 = vector.load %arg6[%c0_14, %c0_15] : memref<256x256xf32, #tpu.memory_space<vmem>>, vector<256x256xf32>
      tpu.vector_store %arg6[%c0_14, %c0_15], %15 {strides = array<i32>} : memref<256x256xf32, #tpu.memory_space<vmem>>, vector<256x256xf32>,
    } else {
    }
    return
  }
  func.func @transform_0(%arg0: i32, %arg1: i32, %arg2: i32) -> (i32, i32) {
    %c0_i32 = arith.constant 0 : i32
    return %arg1, %arg2 : i32, i32
  }
  func.func @transform_1(%arg0: i32, %arg1: i32, %arg2: i32) -> (i32, i32) {
    %c0_i32 = arith.constant 0 : i32
    return %arg2, %arg0 : i32, i32
  }
  func.func @transform_2(%arg0: i32, %arg1: i32, %arg2: i32) -> (i32, i32) {
    %c0_i32 = arith.constant 0 : i32
    %c0_i32_0 = arith.constant 0 : i32
    return %c0_i32, %arg0 : i32, i32
  }
  func.func @transform_3(%arg0: i32, %arg1: i32, %arg2: i32) -> (i32, i32) {
    %c0_i32 = arith.constant 0 : i32
    return %arg1, %arg0 : i32, i32
  }
}

</mosaic_0001>

<bundles_post_ra>
// kernel: tpu_custom_call.1
= control target key start
LH: loop header
LB: loop body
LE: loop exit
PB: predicated region body
PF: predicated region fallthrough
CT: control target
= control target key end

     0   :  { %s2495_s0 = inlined_call_operand.hbm [shape: f32[512,256], index: 0, kind: input, shape index: {}]   ;;  %s2496_s1 = inlined_call_operand.hbm [shape: f32[256,768], index: 1, kind: input, shape index: {}]   ;;  %s2497_s2 = inlined_call_operand.hbm [shape: f32[1,768], index: 2, kind: input, shape index: {}]   ;;  %s2498_s3 = inlined_call_operand.hbm [shape: f32[512,768], index: 3, kind: output, shape index: {}]  }
   0x1   :  { %2517 = sst [smem:[#allocation25_spill]] %s2495_s0 }
   0x2   :  { %2518 = sst [smem:[#allocation26_spill]] %s2496_s1 }
   0x3   :  { %2519 = sst [smem:[#allocation27_spill]] %s2498_s3 }
   0x4   :  { %8 = vsyncpa [#allocation4], 0 }
   0x5   :  { %10 = vsyncpa [#allocation4 + $0x1], 0 }
   0x6   :  { %11 = vsyncpa [#allocation7], 0 }
   0x7   :  { %13 = vsyncpa [#allocation7 + $0x1], 0 }
   0x8   :  { %14 = vsyncpa [#allocation5], 0 }
   0x9   :  { %16 = vsyncpa [#allocation5 + $0x1], 0  ;;  %s1851_s12 = smov 0   ;;  %s1853_s13 = smov 0  }
   0xa   :  { %s1855_s14 = smov 0   ;;  %s1857_s15 = smov 0  }
   0xb   :  { %s1859_s16 = smov 0   ;;  %s1861_s17 = smov 0  }
   0xc   :  { %s1863_s18 = smov 0   ;;  %s1865_s19 = smov 0  }
   0xd   :  { %s1867_s20 = smov 0   ;;  %s1869_s21 = smov 0  }
   0xe   :  { %s1871_s22 = smov 0   ;;  %s1873_s23 = smov 0  }
   0xf   :  { %s1875_s24 = smov 0   ;;  %s1877_s25 = smov 0  }
  0x10 LB: > { %2520 = sst [smem:[#allocation13_spill]] %s1767_s12  ;;  %p2500_p0 = scmp.eq.s32.totalorder %s1819_s25, 0  ;;  %s1819_s25 = sphi %s1877_s25, %s22_s25   ;;  %s1815_s24 = sphi %s1875_s24, %s2579_s24   ;;  %s1811_s23 = sphi %s1873_s23, %s2569_s23   ;;  %s1807_s22 = sphi %s1871_s22, %s2578_s22   ;;  %s1803_s21 = sphi %s1869_s21, %s2568_s21   ;;  %s1799_s20 = sphi %s1867_s20, %s2567_s20   ;;  %s1795_s19 = sphi %s1865_s19, %s2577_s19   ;;  %s1791_s18 = sphi %s1863_s18, %s2576_s18   ;;  %s1787_s17 = sphi %s1861_s17, %s2565_s17   ;;  %s1783_s16 = sphi %s1859_s16, %s2575_s16   ;;  %s1779_s15 = sphi %s1857_s15, %s2574_s15   ;;  %s1775_s14 = sphi %s1855_s14, %s2563_s14   ;;  %s1771_s13 = sphi %s1853_s13, %s2573_s13   ;;  %s1767_s12 = sphi %s1851_s12, %s2572_s12  }
  0x11   : > { %2521 = sst [smem:[#allocation14_spill]] %s1775_s14  ;;  %p85_p1 = scmp.ne.s32.totalorder %s1787_s17, %s1783_s16 }
  0x12   : > { %2522 = sst [smem:[#allocation15_spill]] %s1787_s17  ;;  %p2499_p3 = scmp.lt.s32.totalorder %s1819_s25, 6 }
  0x13   : > { %2523 = sst [smem:[#allocation16_spill]] %s1799_s20  ;;  %p87_p4 = por %p85_p1, %p2500_p0 }
  0x14   : > { %2524 = sst [smem:[#allocation17_spill]] %s1807_s22  ;;  %s193_s27 = sand.u32 1, %s1819_s25  }
  0x15   : > { %2525 = sst [smem:[#allocation18_spill]] %s1811_s23  ;;  %s2501_s28 = sand.u32 1, %s1787_s17  }
  0x16   : > { %s1318_s29 = sshll.u32 %s2501_s28, 9  ;;  %s1338_s30 = sshll.u32 %s1815_s24, 8 }
  0x17   : > { %s2526_s1 = sld [smem:[#allocation26_spill]]  ;;  %s197_s7 = scalar_lea.vmem [#allocation6], %s1318_s29 }
  0x18   : > { %s207_s8 = sshll.u32 %s197_s7, 4  ;;  %p1942_p5 = pnand %p2499_p3, %p87_p4  ;;  %s1946_s8 = int_to_ptr.vmem [resolvable:$true] %s207_s8 }
  0x19   : > { %p1324_p6 = scmp.ge.s32.totalorder %s1819_s25, 1  ;;  %s1949_s10 = scalar_lea.sflag [#allocation7], %s193_s27 }
  0x1a   : > { %p2506_p8 = pneg %p1942_p5 }
  0x1d   : > { %s1938_s6 = scalar_lea.hbm %s2526_s1, %s1338_s30  ;;  %s1584_s4 = scalar_lea.hbm %s2526_s1, 24576 }
  0x1e   : > { %s1579_s11 = scalar_lea.hbm %s1938_s6, 8192  ;;  %p1585_p11 = scmp.lt.u32.totalorder %s1938_s6, %s2526_s1 }
  0x1f   : > { %p1580_p7 = scmp.ne.s32.totalorder %s1938_s6, %s1579_s11  ;;  %p1586_p12 = scmp.lt.u32.totalorder %s1584_s4, %s1579_s11 }
  0x20   : > { %p1588_p1 = scmp.lt.u32.totalorder %s1579_s11, %s1938_s6 }
  0x21   : > { %p1582_p9 = pnand %p2506_p8, %p1580_p7  ;;  %p1587_p13 = por %p1586_p12, %p1585_p11 }
  0x23   : > { %p1583_p10 = pneg %p1582_p9  ;;  %p1589_p4 = por %p1588_p1, %p1587_p13 }
  0x25   : > { %p1590_p3 = pnand %p1589_p4, %p1583_p10 }
  0x27   : > { %1593 = shalt.err (!%p1590_p3)
}
  0x28   : > { %s1594_s27 = scalar_lea.vmem %s1946_s8, 8192  ;;  %s1821_s29 = smov [#allocation6]  }
  0x29   : > { %p1595_p7 = scmp.ne.s32.totalorder %s1946_s8, %s1594_s27  ;;  %s1599_s30 = sshll.u32 %s1821_s29, 4  ;;  %s1600_s30 = int_to_ptr.vmem [resolvable:$false] %s1599_s30 }
  0x2a   : > { %s1601_s5 = scalar_lea.vmem %s1600_s30, 16384  ;;  %p1602_p0 = scmp.lt.s32.totalorder %s1946_s8, %s1600_s30 }
  0x2b   : > { %p1597_p9 = pnand %p1595_p7, %p2506_p8  ;;  %p1603_p11 = scmp.lt.s32.totalorder %s1601_s5, %s1594_s27 }
  0x2d   : > { %p1598_p2 = pneg %p1597_p9  ;;  %p1604_p12 = por %p1603_p11, %p1602_p0 }
  0x2f   : > { %p1605_p13 = pnand %p1604_p12, %p1598_p2 }
  0x31   : > { %1608 = shalt.err (!%p1605_p13)
}
  0x32   : > { %s1822_s11 = smov 768   ;;  %s2502_s4 = smov 256  }
  0x33   : > { %s2503_s7 = smov 16   ;;  %p234_p0 = scmp.lt.s32.totalorder %s1819_s25, 7 }
  0x34   : > { %1451 = dma.hbm_to_vmem [thread:$0]  (!%p1942_p5), %s1938_s6, 8192, %s1946_s8, %s1949_s10, %s1822_s11, %s2502_s4, %s2503_s7  }
  0x35   : > { %p1982_p2 = pnand %p1324_p6, %p234_p0  ;;  %s1987_s29 = sadd.s32 4294967295, %s1819_s25  }
  0x36   : > { %s1311_s30 = sadd.s32 4294967294, %s1819_s25   ;;  %s37_s5 = sadd.s32 1, %s1811_s23 }
  0x37   : > { %s2528_s27 = scalar_select %p1982_p2, 1, 0 }
  0x38   : > { %s41_s28 = sadd.s32 1, %s1815_s24  ;;  %p39_p3 = scmp.ge.s32.totalorder %s37_s5, 2 }
  0x39   : > { %s50_s26 = sadd.s32 1, %s1799_s20  ;;  %p57_p10 = scmp.ne.s32.totalorder %s1799_s20, %s1795_s19 }
  0x3a   : > { %p63_p1 = scmp.ne.s32.totalorder %s1795_s19, %s1791_s18  ;;  %s2581_s5 = smov (%p39_p3, %s37_s5), 0 }
  0x3b   : > { %2529 = sst [smem:[#allocation19_spill]] %s2581_s5  ;;  %s2583_s28 = smov (!%p39_p3, %s41_s28), %s1815_s24 }
  0x3c   : > { %s45_s6 = ssub.s32 %s1811_s23, %s2581_s5  ;;  %p2530_p6 = scmp.eq.s32.totalorder %s1819_s25, 0 }
  0x3d   : > { %p43_p7 = scmp.ge.s32.totalorder %s2583_s28, 3  ;;  %p48_p9 = scmp.eq.s32.totalorder %s45_s6, 0 }
  0x3e   : > { %p2004_p4 = por %p2530_p6, %p57_p10  ;;  %p64_p11 = scmp.eq.s32.totalorder %s1987_s29, 0 }
  0x3f   : > { %s132_s18 = sadd.s32 1, %s1775_s14  ;;  %s2585_s28 = smov (%p43_p7, %s2583_s28), 0 }
  0x40   : > { %2532 = sst [smem:[#allocation20_spill]] %s2585_s28  ;;  %p2015_p12 = por %p64_p11, %p63_p1 }
  0x41   : > { %s2013_s11 = scalar_select %p48_p9, %s1799_s20, %s50_s26  }
  0x42   : > { %s2534_s4 = scalar_select %p2015_p12, 1, 0 }
  0x43   : > { %2533 = sst [smem:[#allocation21_spill]] %s2013_s11  ;;  %s74_s7 = ssub.s32 %s1815_s24, %s2585_s28 }
  0x44   : > { %p76_p13 = scmp.eq.s32.totalorder %s74_s7, 0  ;;  %p2535_p0 = scmp.ne.s32.totalorder %s1783_s16, %s1779_s15 }
  0x45   : > { %s129_s5 = sor.u32 %s74_s7, %s45_s6  ;;  %p142_p10 = scmp.ne.s32.totalorder %s1775_s14, %s1771_s13 }
  0x46   : > { %p2024_p3 = por %p2535_p0, %p64_p11  ;;  %s2537_s3 = sadd.s32 1, %s1787_s17 }
  0x47   : > { %s2033_s22 = scalar_select %p76_p13, %s1787_s17, %s2537_s3  }
  0x48   : > { %s2536_s1 = scalar_select %p2024_p3, 1, 0 }
  0x49   : > { %2538 = sst [smem:[#allocation22_spill]] %s2033_s22  ;;  %p130_p6 = scmp.eq.s32.totalorder %s129_s5, 0 }
  0x4a   : > { %p143_p1 = scmp.eq.s32.totalorder %s1987_s29, 5  ;;  %p148_p7 = scmp.ne.s32.totalorder %s1771_s13, %s1767_s12 }
  0x4b   : > { %p149_p9 = scmp.eq.s32.totalorder %s1311_s30, 5  ;;  %s169_s7 = sand.u32 1, %s1799_s20  }
  0x4c   : > { %s2039_s26 = scalar_select %p130_p6, %s1775_s14, %s132_s18  }
  0x4d   : > { %p2041_p8 = por %p143_p1, %p142_p10  ;;  %p2045_p11 = por %p149_p9, %p148_p7 }
  0x4e   : > { %2539 = sst [smem:[#allocation23_spill]] %s2039_s26  ;;  %s1337_s6 = sshll.u32 %s1811_s23, 13 }
  0x4f   : > { %s2540_s15 = scalar_select %p2041_p8, 1, 0 }
  0x50   : > { %s2541_s28 = scalar_select %p2045_p11, 1, 0 }
  0x51   : > { %s1314_s11 = sshll.u32 %s169_s7, 9  ;;  %s2543_s0 = sld [smem:[#allocation25_spill]] }
  0x52   : > { %2542 = sst [smem:[#allocation24_spill]] %s2541_s28  ;;  %s173_s30 = scalar_lea.vmem [#allocation3], %s1314_s11 }
  0x53   : > { %s183_s18 = sshll.u32 %s173_s30, 4  ;;  %p2544_p13 = scmp.lt.s32.totalorder %s1819_s25, 6  ;;  %s2064_s18 = int_to_ptr.vmem [resolvable:$true] %s183_s18 }
  0x54   : > { %s2546_s23 = sand.u32 1, %s1787_s17  }
  0x55   : > { %p2060_p0 = pnand %p2544_p13, %p2004_p4  ;;  %s2068_s22 = sshll.u32 %s2546_s23, 1 }
  0x57   : > { %s2054_s5 = scalar_lea.hbm %s2543_s0, %s1337_s6  ;;  %s2070_s6 = scalar_lea.sflag [#allocation4], %s169_s7 }
  0x58   : > { %s1609_s3 = scalar_lea.hbm %s2054_s5, 8192  ;;  %p1611_p6 = pneg %p2060_p0 }
  0x59   : > { %p1610_p10 = scmp.ne.s32.totalorder %s2054_s5, %s1609_s3  ;;  %s1614_s30 = scalar_lea.hbm %s2543_s0, 16384 }
  0x5a   : > { %p1615_p7 = scmp.lt.u32.totalorder %s2054_s5, %s2543_s0  ;;  %p1616_p9 = scmp.lt.u32.totalorder %s1614_s30, %s1609_s3 }
  0x5b   : > { %p1612_p1 = pnand %p1611_p6, %p1610_p10  ;;  %p1618_p11 = scmp.lt.u32.totalorder %s1609_s3, %s2054_s5 }
  0x5c   : > { %p1617_p13 = por %p1616_p9, %p1615_p7 }
  0x5d   : > { %p1613_p4 = pneg %p1612_p1 }
  0x5e   : > { %p1619_p8 = por %p1618_p11, %p1617_p13 }
  0x60   : > { %p1620_p3 = pnand %p1619_p8, %p1613_p4 }
  0x62   : > { %1623 = shalt.err (!%p1620_p3)
}
  0x63   : > { %s1624_s23 = scalar_lea.vmem %s2064_s18, 8192  ;;  %s1825_s7 = smov [#allocation3]  }
  0x64   : > { %p1625_p10 = scmp.ne.s32.totalorder %s2064_s18, %s1624_s23  ;;  %s1629_s8 = sshll.u32 %s1825_s7, 4  ;;  %s1630_s8 = int_to_ptr.vmem [resolvable:$false] %s1629_s8 }
  0x65   : > { %s1631_s14 = scalar_lea.vmem %s1630_s8, 16384  ;;  %p1632_p2 = scmp.lt.s32.totalorder %s2064_s18, %s1630_s8 }
  0x66   : > { %p1627_p1 = pnand %p1625_p10, %p1611_p6  ;;  %p1633_p7 = scmp.lt.s32.totalorder %s1631_s14, %s1624_s23 }
  0x68   : > { %p1628_p12 = pneg %p1627_p1  ;;  %p1634_p9 = por %p1633_p7, %p1632_p2 }
  0x6a   : > { %p1635_p11 = pnand %p1634_p9, %p1628_p12 }
  0x6c   : > { %1638 = shalt.err (!%p1635_p11)
}
  0x6d   : > { %s2547_s20 = smov 16   ;;  %s2548_s3 = smov 256  }
  0x6e   : > { %1448 = dma.hbm_to_vmem [thread:$0]  (!%p2060_p0), %s2054_s5, 8192, %s2064_s18, %s2070_s6, %s2548_s3, %s2548_s3, %s2547_s20  }
  0x6f   : > { %s1339_s11 = sshll.u32 %s1815_s24, 5  ;;  %s221_s30 = scalar_lea.vmem [#allocation8], %s2068_s22 }
  0x70   : > { %s229_s7 = sshll.u32 %s221_s30, 4  ;;  %s227_s14 = scalar_lea.hbm %s2497_s2, %s1339_s11  ;;  %s230_s7 = int_to_ptr.vmem [resolvable:$true] %s229_s7 }
  0x71   : > { %s1639_s0 = scalar_lea.hbm %s227_s14, 32  ;;  %p2549_p2 = pneg %p1942_p5 }
  0x72   : > { %p1640_p8 = scmp.ne.s32.totalorder %s227_s14, %s1639_s0  ;;  %s1644_s28 = scalar_lea.hbm %s2497_s2, 96 }
  0x73   : > { %p1645_p0 = scmp.lt.u32.totalorder %s227_s14, %s2497_s2  ;;  %p1646_p6 = scmp.lt.u32.totalorder %s1644_s28, %s1639_s0 }
  0x74   : > { %p1642_p12 = pnand %p1640_p8, %p2549_p2  ;;  %p1648_p13 = scmp.lt.u32.totalorder %s1639_s0, %s227_s14 }
  0x75   : > { %p1647_p4 = por %p1646_p6, %p1645_p0 }
  0x76   : > { %p1643_p3 = pneg %p1642_p12 }
  0x77   : > { %p1649_p10 = por %p1648_p13, %p1647_p4 }
  0x79   : > { %p1650_p1 = pnand %p1649_p10, %p1643_p3 }
  0x7b   : > { %1653 = shalt.err (!%p1650_p1)
}
  0x7c   : > { %s1654_s18 = scalar_lea.vmem %s230_s7, 32  ;;  %p2550_p9 = pmov %p2549_p2 }
  0x7d   : > { %p1655_p7 = scmp.ne.s32.totalorder %s230_s7, %s1654_s18  ;;  %s1826_s22 = smov [#allocation8]  }
  0x7e   : > { %s1659_s17 = sshll.u32 %s1826_s22, 4  ;;  %s1660_s17 = int_to_ptr.vmem [resolvable:$false] %s1659_s17 }
  0x7f   : > { %p1657_p11 = pnand %p1655_p7, %p2550_p9  ;;  %s1661_s6 = scalar_lea.vmem %s1660_s17, 64 }
  0x80   : > { %p1662_p2 = scmp.lt.s32.totalorder %s230_s7, %s1660_s17  ;;  %p1663_p12 = scmp.lt.s32.totalorder %s1661_s6, %s1654_s18 }
  0x81   : > { %p1658_p8 = pneg %p1657_p11 }
  0x82   : > { %p1664_p0 = por %p1663_p12, %p1662_p2 }
  0x84   : > { %p1665_p6 = pnand %p1664_p0, %p1658_p8 }
  0x86   : > { %1668 = shalt.err (!%p1665_p6)
}
  0x87   : > { %1454 = dma.hbm_to_vmem [thread:$0]  (!%p1942_p5), %s227_s14, 32, %s230_s7, %s1949_s10  }
  0x88   : > { %p2551_p3 = scmp.ne.s32.totalorder %s2528_s27, 0 }
  0x89   : > { %s240_s0 = sand.u32 (!%p2551_p3), 1, %s1795_s19   ;;  %p2552_p4 = scmp.ne.s32.totalorder (!%p2551_p3), %s2534_s4, 0 }
  0x8a   : > { %238 = sbr.rel (%p2551_p3) target bundleno = 509 (0x1fd), region = 32  ;;  %s1325_s12 = sshll.u32 (!%p2551_p3), %s240_s0, 9 }
  0x8b   : > { %s241_s28 = scalar_lea.sflag (!%p2551_p3), [#allocation4], %s240_s0  ;;  %s2124_s20 = scalar_lea.vmem (!%p2551_p3), [#allocation3], %s1325_s12 }
  0x91   : > { %1754 = dma.done.wait (%p2552_p4), %s241_s28, 8192  }
  0x92   : > { %1756 = vsyncadd (%p2552_p4), %s241_s28, 4294959104  ;;  %s249_s9 = sand.u32 1, %s1987_s29   ;;  %s251_s10 = sand.u32 1, %s1783_s16  }
  0x93   : > { %s1326_s27 = sshll.u32 %s251_s10, 9  ;;  %s250_s3 = scalar_lea.sflag [#allocation7], %s249_s9 }
  0x94   : > { %s2134_s11 = scalar_lea.vmem [#allocation6], %s1326_s27  ;;  %p2553_p5 = scmp.ne.s32.totalorder %s2536_s1, 0 }
  0x96   : > { %1758 = dma.done.wait (%p2553_p5), %s250_s3, 8224  }
  0x97   : > { %1760 = vsyncadd (%p2553_p5), %s250_s3, 4294959072  ;;  %v499_v0 = vld [vmem:[%s2134_s11 + $0x8] sm:$0xff]  ;;  %v501_v1 = vld [vmem:[%s2134_s11 + $0x18] sm:$0xff]  ;;  %s1327_s1 = sshll.u32 %s251_s10, 1  ;;  %s292_s4 = sand.u32 1, %s1771_s13  }
  0x98   : > { %v498_v2 = vld [vmem:[%s2134_s11] sm:$0xff]  ;;  %v1340_v3 = vpack.c.bf16 %v501_v1, %v499_v0  ;;  %v500_v4 = vld [vmem:[%s2134_s11 + $0x10] sm:$0xff]  ;;  %v503_v5 = vld [vmem:[%s2134_s11 + $0x28] sm:$0xff]  ;;  %s262_s29 = scalar_lea.vmem [#allocation8], %s1327_s1  ;;  %s1328_s30 = sshll.u32 %s292_s4, 9 }
  0x99   : > { %v505_v6 = vld [vmem:[%s2134_s11 + $0x38] sm:$0xff]  ;;  %v1342_v7 = vpack.c.bf16 %v500_v4, %v498_v2  ;;  %v502_v9 = vld [vmem:[%s2134_s11 + $0x20] sm:$0xff]  ;;  %v504_v10 = vld [vmem:[%s2134_s11 + $0x30] sm:$0xff]  ;;  %s2281_s7 = scalar_lea.vmem [#allocation9], %s1328_s30  ;;  %s2554_s8 = sld [smem:[#allocation17_spill]] }
  0x9a   : > { %v1344_v8 = vpack.c.bf16 %v505_v6, %v503_v5  ;;  %v507_v11 = vld [vmem:[%s2134_s11 + $0x48] sm:$0xff]  ;;  %1341 = vmatprep.subr.bf16.mxu0 %v1340_v3  ;;  %1404 = vmatprep.subr.bf16.mxu1 %v1340_v3  ;;  %v509_v12 = vld [vmem:[%s2134_s11 + $0x58] sm:$0xff]  ;;  %v1346_v13 = vpack.c.bf16 %v504_v10, %v502_v9  ;;  %v506_v15 = vld [vmem:[%s2134_s11 + $0x40] sm:$0xff]  ;;  %s1436_s23 = smul.u32 192, %s1803_s21  ;;  %s1171_s5 = sshll.u32 %s2281_s7, 4  ;;  %s2409_s5 = int_to_ptr.vmem [resolvable:$true] %s1171_s5 }
  0x9b   : > { %1343 = vmatpush1.bf16.msra.mxu0 %v1342_v7  ;;  %1420 = vmatpush1.bf16.msra.mxu1 %v1342_v7  ;;  %v1348_v14 = vpack.c.bf16 %v509_v12, %v507_v11  ;;  %v508_v16 = vld [vmem:[%s2134_s11 + $0x50] sm:$0xff]  ;;  %v511_v17 = vld [vmem:[%s2134_s11 + $0x68] sm:$0xff]  ;;  %v513_v18 = vld [vmem:[%s2134_s11 + $0x78] sm:$0xff]  ;;  %s2555_s17 = sld [smem:[#allocation27_spill]]  ;;  %s2419_s12 = scalar_lea.sflag [#allocation5], %s292_s4 }
  0x9c   : > { %1345 = vmatprep.subr.bf16.mxu0 %v1344_v8  ;;  %1405 = vmatprep.subr.bf16.mxu1 %v1344_v8  ;;  %v1350_v19 = vpack.c.bf16 %v508_v16, %v506_v15  ;;  %v1352_v20 = vpack.c.bf16 %v513_v18, %v511_v17  ;;  %v510_v21 = vld [vmem:[%s2134_s11 + $0x60] sm:$0xff]  ;;  %v512_v22 = vld [vmem:[%s2134_s11 + $0x70] sm:$0xff]  ;;  %v515_v23 = vld [vmem:[%s2134_s11 + $0x88] sm:$0xff]  ;;  %s1669_s28 = scalar_lea.vmem %s2409_s5, 8192  ;;  %p2557_p10 = scmp.ne.s32.totalorder %s2540_s15, 0 }
  0x9d   : > { %v517_v24 = vld [vmem:[%s2134_s11 + $0x98] sm:$0xff]  ;;  %v1354_v25 = vpack.c.bf16 %v512_v22, %v510_v21  ;;  %v514_v27 = vld [vmem:[%s2134_s11 + $0x80] sm:$0xff]  ;;  %v516_v28 = vld [vmem:[%s2134_s11 + $0x90] sm:$0xff]  ;;  %p1670_p13 = scmp.ne.s32.totalorder %s2409_s5, %s1669_s28 }
  0x9e   : > { %v1356_v26 = vpack.c.bf16 %v517_v24, %v515_v23  ;;  %v519_v29 = vld [vmem:[%s2134_s11 + $0xa8] sm:$0xff]  ;;  %v521_v30 = vld [vmem:[%s2134_s11 + $0xb8] sm:$0xff]  ;;  %v1358_v31 = vpack.c.bf16 %v516_v28, %v514_v27  ;;  %v518_v33 = vld [vmem:[%s2134_s11 + $0xa0] sm:$0xff] }
  0x9f   : > { %1347 = vmatpush1.bf16.msra.mxu0 %v1346_v13  ;;  %1421 = vmatpush1.bf16.msra.mxu1 %v1346_v13  ;;  %v1360_v32 = vpack.c.bf16 %v521_v30, %v519_v29  ;;  %v520_v34 = vld [vmem:[%s2134_s11 + $0xb0] sm:$0xff]  ;;  %v523_v35 = vld [vmem:[%s2134_s11 + $0xc8] sm:$0xff]  ;;  %v525_v36 = vld [vmem:[%s2134_s11 + $0xd8] sm:$0xff]  ;;  %s1331_s14 = sshll.u32 %s2554_s8, 1  ;;  %p1671_p1 = pnand %p1670_p13, %p2557_p10 }
  0xa0   : > { %1349 = vmatprep.subr.bf16.mxu0 %v1348_v14  ;;  %1406 = vmatprep.subr.bf16.mxu1 %v1348_v14  ;;  %v1362_v37 = vpack.c.bf16 %v520_v34, %v518_v33  ;;  %v522_v38 = vld [vmem:[%s2134_s11 + $0xc0] sm:$0xff]  ;;  %v1364_v39 = vpack.c.bf16 %v525_v36, %v523_v35  ;;  %v524_v40 = vld [vmem:[%s2134_s11 + $0xd0] sm:$0xff]  ;;  %v435_v41 = vld [vmem:[%s2124_s20 + $0x8] sm:$0xff]  ;;  %s1168_s21 = sadd.s32 %s1436_s23, %s1331_s14 }
  0xa1   : > { %v467_v42 = vld [vmem:[%s2124_s20 + $0x108] sm:$0xff]  ;;  %v529_v44 = vld [vmem:[%s2134_s11 + $0xf8] sm:$0xff]  ;;  %626 = vmatprep.mubr.f32.mxu0 %v435_v41  ;;  %v1366_v45 = vpack.c.bf16 %v524_v40, %v522_v38  ;;  %v526_v47 = vld [vmem:[%s2134_s11 + $0xe0] sm:$0xff]  ;;  %s1333_s26 = sshll.u32 %s1168_s21, 7  ;;  %s2556_s6 = smov %s2555_s17 }
  0xa2   : > { %v527_v43 = vld [vmem:[%s2134_s11 + $0xe8] sm:$0xff]  ;;  %722 = vmatprep.mubr.f32.mxu1 %v467_v42  ;;  %v528_v48 = vld [vmem:[%s2134_s11 + $0xf0] sm:$0xff]  ;;  %v533_v50 = vld [vmem:[%s2134_s11 + $0x118] sm:$0xff]  ;;  %s2405_s0 = scalar_lea.hbm %s2555_s17, %s1333_s26  ;;  %p1672_p7 = pneg %p1671_p1 }
  0xa3   : > { %1351 = vmatpush1.bf16.msra.mxu0 %v1350_v19  ;;  %1422 = vmatpush1.bf16.msra.mxu1 %v1350_v19  ;;  %v1368_v46 = vpack.c.bf16 %v529_v44, %v527_v43  ;;  %v531_v49 = vld [vmem:[%s2134_s11 + $0x108] sm:$0xff]  ;;  %v1370_v51 = vpack.c.bf16 %v528_v48, %v526_v47  ;;  %v530_v53 = vld [vmem:[%s2134_s11 + $0x100] sm:$0xff]  ;;  %v532_v54 = vld [vmem:[%s2134_s11 + $0x110] sm:$0xff] }
  0xa4   : > { %1353 = vmatprep.subr.bf16.mxu0 %v1352_v20  ;;  %1407 = vmatprep.subr.bf16.mxu1 %v1352_v20  ;;  %v1372_v52 = vpack.c.bf16 %v533_v50, %v531_v49  ;;  %v535_v55 = vld [vmem:[%s2134_s11 + $0x128] sm:$0xff]  ;;  %v537_v56 = vld [vmem:[%s2134_s11 + $0x138] sm:$0xff]  ;;  %v1374_v57 = vpack.c.bf16 %v532_v54, %v530_v53  ;;  %v534_v59 = vld [vmem:[%s2134_s11 + $0x120] sm:$0xff] }
  0xa5   : > { %v1376_v58 = vpack.c.bf16 %v537_v56, %v535_v55  ;;  %v536_v60 = vld [vmem:[%s2134_s11 + $0x130] sm:$0xff]  ;;  %v539_v61 = vld [vmem:[%s2134_s11 + $0x148] sm:$0xff]  ;;  %v541_v62 = vld [vmem:[%s2134_s11 + $0x158] sm:$0xff] }
  0xa6   : > { %v1378_v63 = vpack.c.bf16 %v536_v60, %v534_v59  ;;  %v1380_v0 = vpack.c.bf16 %v541_v62, %v539_v61  ;;  %v538_v1 = vld [vmem:[%s2134_s11 + $0x140] sm:$0xff]  ;;  %v540_v2 = vld [vmem:[%s2134_s11 + $0x150] sm:$0xff]  ;;  %v543_v3 = vld [vmem:[%s2134_s11 + $0x168] sm:$0xff] }
  0xa7   : > { %1355 = vmatpush1.bf16.msra.mxu0 %v1354_v25  ;;  %1423 = vmatpush1.bf16.msra.mxu1 %v1354_v25  ;;  %v545_v4 = vld [vmem:[%s2134_s11 + $0x178] sm:$0xff]  ;;  %v1382_v5 = vpack.c.bf16 %v540_v2, %v538_v1  ;;  %v542_v7 = vld [vmem:[%s2134_s11 + $0x160] sm:$0xff]  ;;  %v544_v8 = vld [vmem:[%s2134_s11 + $0x170] sm:$0xff] }
  0xa8   : > { %1357 = vmatprep.subr.bf16.mxu0 %v1356_v26  ;;  %1408 = vmatprep.subr.bf16.mxu1 %v1356_v26  ;;  %v1384_v6 = vpack.c.bf16 %v545_v4, %v543_v3  ;;  %v547_v9 = vld [vmem:[%s2134_s11 + $0x188] sm:$0xff]  ;;  %v549_v10 = vld [vmem:[%s2134_s11 + $0x198] sm:$0xff]  ;;  %v1386_v11 = vpack.c.bf16 %v544_v8, %v542_v7  ;;  %v546_v13 = vld [vmem:[%s2134_s11 + $0x180] sm:$0xff] }
  0xa9   : > { %v1388_v12 = vpack.c.bf16 %v549_v10, %v547_v9  ;;  %v548_v14 = vld [vmem:[%s2134_s11 + $0x190] sm:$0xff]  ;;  %v551_v15 = vld [vmem:[%s2134_s11 + $0x1a8] sm:$0xff]  ;;  %v553_v16 = vld [vmem:[%s2134_s11 + $0x1b8] sm:$0xff] }
  0xaa   : > { %v1390_v17 = vpack.c.bf16 %v548_v14, %v546_v13  ;;  %v1392_v18 = vpack.c.bf16 %v553_v16, %v551_v15  ;;  %v550_v19 = vld [vmem:[%s2134_s11 + $0x1a0] sm:$0xff]  ;;  %v552_v20 = vld [vmem:[%s2134_s11 + $0x1b0] sm:$0xff]  ;;  %v555_v21 = vld [vmem:[%s2134_s11 + $0x1c8] sm:$0xff] }
  0xab   : > { %1359 = vmatpush1.bf16.msra.mxu0 %v1358_v31  ;;  %1424 = vmatpush1.bf16.msra.mxu1 %v1358_v31  ;;  %v557_v22 = vld [vmem:[%s2134_s11 + $0x1d8] sm:$0xff]  ;;  %v1394_v23 = vpack.c.bf16 %v552_v20, %v550_v19  ;;  %v554_v25 = vld [vmem:[%s2134_s11 + $0x1c0] sm:$0xff]  ;;  %v556_v26 = vld [vmem:[%s2134_s11 + $0x1d0] sm:$0xff] }
  0xac   : > { %1361 = vmatprep.subr.bf16.mxu0 %v1360_v32  ;;  %1409 = vmatprep.subr.bf16.mxu1 %v1360_v32  ;;  %v1396_v24 = vpack.c.bf16 %v557_v22, %v555_v21  ;;  %v559_v27 = vld [vmem:[%s2134_s11 + $0x1e8] sm:$0xff]  ;;  %v561_v28 = vld [vmem:[%s2134_s11 + $0x1f8] sm:$0xff]  ;;  %v1398_v29 = vpack.c.bf16 %v556_v26, %v554_v25  ;;  %v558_v31 = vld [vmem:[%s2134_s11 + $0x1e0] sm:$0xff] }
  0xad   : > { %v1400_v30 = vpack.c.bf16 %v561_v28, %v559_v27  ;;  %v560_v32 = vld [vmem:[%s2134_s11 + $0x1f0] sm:$0xff]  ;;  %v434_v34 = vld [vmem:[%s2124_s20] sm:$0xff]  ;;  %v437_v36 = vld [vmem:[%s2124_s20 + $0x18] sm:$0xff] }
  0xae   : > { %v1402_v33 = vpack.c.bf16 %v560_v32, %v558_v31  ;;  %v466_v35 = vld [vmem:[%s2124_s20 + $0x100] sm:$0xff]  ;;  %v436_v38 = vld [vmem:[%s2124_s20 + $0x10] sm:$0xff]  ;;  %v439_v40 = vld [vmem:[%s2124_s20 + $0x28] sm:$0xff]  ;;  %v1016_v32 = vlaneseq }
  0xaf   : > { %1363 = vmatpush1.bf16.msra.mxu0 %v1362_v37  ;;  %1425 = vmatpush1.bf16.msra.mxu1 %v1362_v37  ;;  %v469_v37 = vld [vmem:[%s2124_s20 + $0x118] sm:$0xff]  ;;  %v471_v41 = vld [vmem:[%s2124_s20 + $0x128] sm:$0xff]  ;;  %v438_v42 = vld [vmem:[%s2124_s20 + $0x20] sm:$0xff] }
  0xb0   : > { %1365 = vmatprep.subr.bf16.mxu0 %v1364_v39  ;;  %1410 = vmatprep.subr.bf16.mxu1 %v1364_v39  ;;  %v468_v39 = vld [vmem:[%s2124_s20 + $0x110] sm:$0xff]  ;;  %v470_v43 = vld [vmem:[%s2124_s20 + $0x120] sm:$0xff]  ;;  %v441_v44 = vld [vmem:[%s2124_s20 + $0x38] sm:$0xff] }
  0xb1   : > { %v472_v47 = vld [vmem:[%s2124_s20 + $0x130] sm:$0xff]  ;;  %v443_v48 = vld [vmem:[%s2124_s20 + $0x48] sm:$0xff]  ;;  %v442_v50 = vld [vmem:[%s2124_s20 + $0x40] sm:$0xff] }
  0xb2   : > { %v475_v49 = vld [vmem:[%s2124_s20 + $0x148] sm:$0xff]  ;;  %v477_v53 = vld [vmem:[%s2124_s20 + $0x158] sm:$0xff]  ;;  %v444_v54 = vld [vmem:[%s2124_s20 + $0x50] sm:$0xff] }
  0xb3   : > { %1367 = vmatpush1.bf16.msra.mxu0 %v1366_v45  ;;  %1426 = vmatpush1.bf16.msra.mxu1 %v1366_v45  ;;  %v473_v45 = vld [vmem:[%s2124_s20 + $0x138] sm:$0xff]  ;;  %v476_v55 = vld [vmem:[%s2124_s20 + $0x150] sm:$0xff]  ;;  %v447_v56 = vld [vmem:[%s2124_s20 + $0x68] sm:$0xff] }
  0xb4   : > { %1369 = vmatprep.subr.bf16.mxu0 %v1368_v46  ;;  %1411 = vmatprep.subr.bf16.mxu1 %v1368_v46  ;;  %v440_v46 = vld [vmem:[%s2124_s20 + $0x30] sm:$0xff]  ;;  %v478_v59 = vld [vmem:[%s2124_s20 + $0x160] sm:$0xff]  ;;  %v449_v60 = vld [vmem:[%s2124_s20 + $0x78] sm:$0xff] }
  0xb5   : > { %v481_v61 = vld [vmem:[%s2124_s20 + $0x178] sm:$0xff]  ;;  %v448_v62 = vld [vmem:[%s2124_s20 + $0x70] sm:$0xff]  ;;  %v483_v1 = vld [vmem:[%s2124_s20 + $0x188] sm:$0xff] }
  0xb6   : > { %v450_v2 = vld [vmem:[%s2124_s20 + $0x80] sm:$0xff]  ;;  %v453_v4 = vld [vmem:[%s2124_s20 + $0x98] sm:$0xff]  ;;  %v484_v7 = vld [vmem:[%s2124_s20 + $0x190] sm:$0xff] }
  0xb7   : > { %1371 = vmatpush1.bf16.msra.mxu0 %v1370_v51  ;;  %1427 = vmatpush1.bf16.msra.mxu1 %v1370_v51  ;;  %v474_v51 = vld [vmem:[%s2124_s20 + $0x140] sm:$0xff]  ;;  %v455_v8 = vld [vmem:[%s2124_s20 + $0xa8] sm:$0xff]  ;;  %v489_v13 = vld [vmem:[%s2124_s20 + $0x1b8] sm:$0xff] }
  0xb8   : > { %1373 = vmatprep.subr.bf16.mxu0 %v1372_v52  ;;  %1412 = vmatprep.subr.bf16.mxu1 %v1372_v52  ;;  %v445_v52 = vld [vmem:[%s2124_s20 + $0x58] sm:$0xff]  ;;  %v482_v3 = vld [vmem:[%s2124_s20 + $0x180] sm:$0xff]  ;;  %v487_v9 = vld [vmem:[%s2124_s20 + $0x1a8] sm:$0xff] }
  0xb9   : > { %v454_v10 = vld [vmem:[%s2124_s20 + $0xa0] sm:$0xff]  ;;  %v456_v14 = vld [vmem:[%s2124_s20 + $0xb0] sm:$0xff]  ;;  %v459_v16 = vld [vmem:[%s2124_s20 + $0xc8] sm:$0xff] }
  0xba   : > { %v488_v15 = vld [vmem:[%s2124_s20 + $0x1b0] sm:$0xff]  ;;  %v490_v19 = vld [vmem:[%s2124_s20 + $0x1c0] sm:$0xff]  ;;  %v461_v20 = vld [vmem:[%s2124_s20 + $0xd8] sm:$0xff] }
  0xbb   : > { %1375 = vmatpush1.bf16.msra.mxu0 %v1374_v57  ;;  %1428 = vmatpush1.bf16.msra.mxu1 %v1374_v57  ;;  %v479_v57 = vld [vmem:[%s2124_s20 + $0x168] sm:$0xff]  ;;  %v493_v21 = vld [vmem:[%s2124_s20 + $0x1d8] sm:$0xff]  ;;  %v460_v22 = vld [vmem:[%s2124_s20 + $0xd0] sm:$0xff] }
  0xbc   : > { %1377 = vmatprep.subr.bf16.mxu0 %v1376_v58  ;;  %1413 = vmatprep.subr.bf16.mxu1 %v1376_v58  ;;  %v446_v58 = vld [vmem:[%s2124_s20 + $0x60] sm:$0xff]  ;;  %v495_v25 = vld [vmem:[%s2124_s20 + $0x1e8] sm:$0xff]  ;;  %v465_v28 = vld [vmem:[%s2124_s20 + $0xf8] sm:$0xff] }
  0xbd   : > { %v462_v26 = vld [vmem:[%s2124_s20 + $0xe0] sm:$0xff]  ;;  %v496_v31 = vld [vmem:[%s2124_s20 + $0x1f0] sm:$0xff] }
  0xbe   : > { %v494_v27 = vld [vmem:[%s2124_s20 + $0x1e0] sm:$0xff] }
  0xbf   : > { %1379 = vmatpush1.bf16.msra.mxu0 %v1378_v63  ;;  %1429 = vmatpush1.bf16.msra.mxu1 %v1378_v63  ;;  %v480_v63 = vld [vmem:[%s2124_s20 + $0x170] sm:$0xff] }
  0xc0   : > { %1381 = vmatprep.subr.bf16.mxu0 %v1380_v0  ;;  %1414 = vmatprep.subr.bf16.mxu1 %v1380_v0  ;;  %v451_v0 = vld [vmem:[%s2124_s20 + $0x88] sm:$0xff] }
  0xc3   : > { %1383 = vmatpush1.bf16.msra.mxu0 %v1382_v5  ;;  %1430 = vmatpush1.bf16.msra.mxu1 %v1382_v5  ;;  %v485_v5 = vld [vmem:[%s2124_s20 + $0x198] sm:$0xff] }
  0xc4   : > { %1385 = vmatprep.subr.bf16.mxu0 %v1384_v6  ;;  %1415 = vmatprep.subr.bf16.mxu1 %v1384_v6  ;;  %v452_v6 = vld [vmem:[%s2124_s20 + $0x90] sm:$0xff] }
  0xc7   : > { %1387 = vmatpush1.bf16.msra.mxu0 %v1386_v11  ;;  %1431 = vmatpush1.bf16.msra.mxu1 %v1386_v11  ;;  %v486_v11 = vld [vmem:[%s2124_s20 + $0x1a0] sm:$0xff] }
  0xc8   : > { %1389 = vmatprep.subr.bf16.mxu0 %v1388_v12  ;;  %1416 = vmatprep.subr.bf16.mxu1 %v1388_v12  ;;  %v457_v12 = vld [vmem:[%s2124_s20 + $0xb8] sm:$0xff] }
  0xcb   : > { %1391 = vmatpush1.bf16.msra.mxu0 %v1390_v17  ;;  %1432 = vmatpush1.bf16.msra.mxu1 %v1390_v17  ;;  %v491_v17 = vld [vmem:[%s2124_s20 + $0x1c8] sm:$0xff] }
  0xcc   : > { %1393 = vmatprep.subr.bf16.mxu0 %v1392_v18  ;;  %1417 = vmatprep.subr.bf16.mxu1 %v1392_v18  ;;  %v458_v18 = vld [vmem:[%s2124_s20 + $0xc0] sm:$0xff] }
  0xcf   : > { %1395 = vmatpush1.bf16.msra.mxu0 %v1394_v23  ;;  %1433 = vmatpush1.bf16.msra.mxu1 %v1394_v23  ;;  %v492_v23 = vld [vmem:[%s2124_s20 + $0x1d0] sm:$0xff] }
  0xd0   : > { %1397 = vmatprep.subr.bf16.mxu0 %v1396_v24  ;;  %1418 = vmatprep.subr.bf16.mxu1 %v1396_v24  ;;  %v463_v24 = vld [vmem:[%s2124_s20 + $0xe8] sm:$0xff] }
  0xd3   : > { %1399 = vmatpush1.bf16.msra.mxu0 %v1398_v29  ;;  %1434 = vmatpush1.bf16.msra.mxu1 %v1398_v29  ;;  %v497_v29 = vld [vmem:[%s2124_s20 + $0x1f8] sm:$0xff] }
  0xd4   : > { %1401 = vmatprep.subr.bf16.mxu0 %v1400_v30  ;;  %1419 = vmatprep.subr.bf16.mxu1 %v1400_v30  ;;  %v464_v30 = vld [vmem:[%s2124_s20 + $0xf0] sm:$0xff]  ;;  %s1827_s20 = smov [#allocation9]  }
  0xd5   : > { %s1673_s9 = sshll.u32 %s1827_s20, 4  ;;  %s1674_s9 = int_to_ptr.vmem [resolvable:$false] %s1673_s9 }
  0xd6   : > { %s1675_s10 = scalar_lea.vmem %s1674_s9, 16384  ;;  %p1676_p9 = scmp.lt.s32.totalorder %s2409_s5, %s1674_s9 }
  0xd7   : > { %1403 = vmatpush1.bf16.msra.mxu0 %v1402_v33  ;;  %1435 = vmatpush1.bf16.msra.mxu1 %v1402_v33  ;;  %v1017_v33 = vshrl.u32 %v1016_v32, 7  ;;  %p1677_p11 = scmp.lt.s32.totalorder %s1675_s10, %s1669_s28 }
  0xd9   : > { %p1678_p8 = por %p1677_p11, %p1676_p9 }
  0xda   : > { %627 = vmatmul.mubr.f32.vlgmr.msra.gmra.mrb[0].mxu0 %v434_v34  ;;  %723 = vmatmul.mubr.f32.vlgmr.msra.gmra.mrb[0].mxu1 %v466_v35  ;;  %v1018_v34 = vsub.s32 0, %v1017_v33  ;;  %v1014_v35 = vld [vmem:[%s262_s29] sm:$0x3] }
  0xdb   : > { %632 = vmatprep.mubr.f32.mxu0 %v437_v36  ;;  %728 = vmatprep.mubr.f32.mxu1 %v469_v37  ;;  %v1022_v36 = vsub.s32 1, %v1017_v33  ;;  %p1679_p2 = pnand %p1678_p8, %p1672_p7 }
  0xdc   : > { %v2273_v37 = vrot.slane %v1014_v35, %v1018_v34 }
  0xde   : > { %633 = vmatmul.mubr.f32.gmra.mrb[2].mxu0 %v436_v38  ;;  %729 = vmatmul.mubr.f32.gmra.mrb[2].mxu1 %v468_v39  ;;  %v2275_v38 = vrot.slane %v1014_v35, %v1022_v36 }
  0xdf   : > { %638 = vmatprep.mubr.f32.mxu0 %v439_v40  ;;  %734 = vmatprep.mubr.f32.mxu1 %v471_v41 }
  0xe2   : > { %639 = vmatmul.mubr.f32.gmra.mrb[4].mxu0 %v438_v42  ;;  %735 = vmatmul.mubr.f32.gmra.mrb[4].mxu1 %v470_v43 }
  0xe3   : > { %644 = vmatprep.mubr.f32.mxu0 %v441_v44  ;;  %740 = vmatprep.mubr.f32.mxu1 %v473_v45 }
  0xe6   : > { %645 = vmatmul.mubr.f32.gmra.mrb[6].mxu0 %v440_v46  ;;  %741 = vmatmul.mubr.f32.gmra.mrb[6].mxu1 %v472_v47 }
  0xe7   : > { %650 = vmatprep.mubr.f32.mxu0 %v443_v48  ;;  %746 = vmatprep.mubr.f32.mxu1 %v475_v49 }
  0xea   : > { %651 = vmatmul.mubr.f32.gmra.mrb[8].mxu0 %v442_v50  ;;  %747 = vmatmul.mubr.f32.gmra.mrb[8].mxu1 %v474_v51 }
  0xeb   : > { %656 = vmatprep.mubr.f32.mxu0 %v445_v52  ;;  %752 = vmatprep.mubr.f32.mxu1 %v477_v53 }
  0xee   : > { %657 = vmatmul.mubr.f32.gmra.mrb[10].mxu0 %v444_v54  ;;  %753 = vmatmul.mubr.f32.gmra.mrb[10].mxu1 %v476_v55 }
  0xef   : > { %662 = vmatprep.mubr.f32.mxu0 %v447_v56  ;;  %758 = vmatprep.mubr.f32.mxu1 %v479_v57 }
  0xf2   : > { %663 = vmatmul.mubr.f32.gmra.mrb[12].mxu0 %v446_v58  ;;  %759 = vmatmul.mubr.f32.gmra.mrb[12].mxu1 %v478_v59 }
  0xf3   : > { %668 = vmatprep.mubr.f32.mxu0 %v449_v60  ;;  %764 = vmatprep.mubr.f32.mxu1 %v481_v61 }
  0xf6   : > { %669 = vmatmul.mubr.f32.gmra.mrb[14].mxu0 %v448_v62  ;;  %765 = vmatmul.mubr.f32.gmra.mrb[14].mxu1 %v480_v63 }
  0xf7   : > { %674 = vmatprep.mubr.f32.mxu0 %v451_v0  ;;  %770 = vmatprep.mubr.f32.mxu1 %v483_v1 }
  0xfa   : > { %675 = vmatmul.mubr.f32.gmra.mrb[16].mxu0 %v450_v2  ;;  %771 = vmatmul.mubr.f32.gmra.mrb[16].mxu1 %v482_v3 }
  0xfb   : > { %680 = vmatprep.mubr.f32.mxu0 %v453_v4  ;;  %776 = vmatprep.mubr.f32.mxu1 %v485_v5 }
  0xfe   : > { %681 = vmatmul.mubr.f32.gmra.mrb[18].mxu0 %v452_v6  ;;  %777 = vmatmul.mubr.f32.gmra.mrb[18].mxu1 %v484_v7 }
  0xff   : > { %686 = vmatprep.mubr.f32.mxu0 %v455_v8  ;;  %782 = vmatprep.mubr.f32.mxu1 %v487_v9 }
 0x102   : > { %687 = vmatmul.mubr.f32.gmra.mrb[20].mxu0 %v454_v10  ;;  %783 = vmatmul.mubr.f32.gmra.mrb[20].mxu1 %v486_v11 }
 0x103   : > { %692 = vmatprep.mubr.f32.mxu0 %v457_v12  ;;  %788 = vmatprep.mubr.f32.mxu1 %v489_v13 }
 0x106   : > { %693 = vmatmul.mubr.f32.gmra.mrb[22].mxu0 %v456_v14  ;;  %789 = vmatmul.mubr.f32.gmra.mrb[22].mxu1 %v488_v15 }
 0x107   : > { %698 = vmatprep.mubr.f32.mxu0 %v459_v16  ;;  %794 = vmatprep.mubr.f32.mxu1 %v491_v17 }
 0x10a   : > { %699 = vmatmul.mubr.f32.gmra.mrb[24].mxu0 %v458_v18  ;;  %795 = vmatmul.mubr.f32.gmra.mrb[24].mxu1 %v490_v19 }
 0x10b   : > { %704 = vmatprep.mubr.f32.mxu0 %v461_v20  ;;  %800 = vmatprep.mubr.f32.mxu1 %v493_v21 }
 0x10e   : > { %705 = vmatmul.mubr.f32.gmra.mrb[26].mxu0 %v460_v22  ;;  %801 = vmatmul.mubr.f32.gmra.mrb[26].mxu1 %v492_v23 }
 0x10f   : > { %710 = vmatprep.mubr.f32.mxu0 %v463_v24  ;;  %806 = vmatprep.mubr.f32.mxu1 %v495_v25 }
 0x112   : > { %711 = vmatmul.mubr.f32.gmra.mrb[28].mxu0 %v462_v26  ;;  %807 = vmatmul.mubr.f32.gmra.mrb[28].mxu1 %v494_v27 }
 0x113   : > { %716 = vmatprep.mubr.f32.mxu0 %v465_v28  ;;  %812 = vmatprep.mubr.f32.mxu1 %v497_v29 }
 0x116   : > { %717 = vmatmul.mubr.f32.gmra.mrb[30].mxu0 %v464_v30  ;;  %813 = vmatmul.mubr.f32.gmra.mrb[30].mxu1 %v496_v31 }
 0x1ad   : > { %v628_v39 = vpop.f32.mrb[0].mxu0  ;;  %v724_v40 = vpop.f32.mrb[0].mxu1 }
 0x1ae   : > { %v1026_v41 = vadd.f32 %v2273_v37, %v628_v39  ;;  %v1058_v42 = vadd.f32 %v2273_v37, %v724_v40  ;;  %v630_v43 = vpop.f32.mrb[1].mxu0  ;;  %v726_v44 = vpop.f32.mrb[1].mxu1 }
 0x1af   : > { %v1027_v45 = vadd.f32 %v2275_v38, %v630_v43  ;;  %v1059_v46 = vadd.f32 %v2275_v38, %v726_v44 }
 0x1b0   : > { %1090 = vst [vmem:[%s2281_s7] sm:$0xff] %v1026_v41  ;;  %1122 = vst [vmem:[%s2281_s7 + $0x100] sm:$0xff] %v1058_v42 }
 0x1b1   : > { %1091 = vst [vmem:[%s2281_s7 + $0x8] sm:$0xff] %v1027_v45  ;;  %1123 = vst [vmem:[%s2281_s7 + $0x108] sm:$0xff] %v1059_v46  ;;  %v634_v47 = vpop.f32.mrb[2].mxu0  ;;  %v730_v48 = vpop.f32.mrb[2].mxu1 }
 0x1b2   : > { %v1028_v49 = vadd.f32 %v2273_v37, %v634_v47  ;;  %v1060_v50 = vadd.f32 %v2273_v37, %v730_v48  ;;  %v636_v51 = vpop.f32.mrb[3].mxu0  ;;  %v732_v52 = vpop.f32.mrb[3].mxu1 }
 0x1b3   : > { %v1029_v53 = vadd.f32 %v2275_v38, %v636_v51  ;;  %v1061_v54 = vadd.f32 %v2275_v38, %v732_v52 }
 0x1b4   : > { %1092 = vst [vmem:[%s2281_s7 + $0x10] sm:$0xff] %v1028_v49  ;;  %1124 = vst [vmem:[%s2281_s7 + $0x110] sm:$0xff] %v1060_v50 }
 0x1b5   : > { %1093 = vst [vmem:[%s2281_s7 + $0x18] sm:$0xff] %v1029_v53  ;;  %1125 = vst [vmem:[%s2281_s7 + $0x118] sm:$0xff] %v1061_v54  ;;  %v640_v55 = vpop.f32.mrb[4].mxu0  ;;  %v736_v56 = vpop.f32.mrb[4].mxu1 }
 0x1b6   : > { %v1030_v57 = vadd.f32 %v2273_v37, %v640_v55  ;;  %v1062_v58 = vadd.f32 %v2273_v37, %v736_v56  ;;  %v642_v59 = vpop.f32.mrb[5].mxu0  ;;  %v738_v60 = vpop.f32.mrb[5].mxu1 }
 0x1b7   : > { %v1031_v61 = vadd.f32 %v2275_v38, %v642_v59  ;;  %v1063_v62 = vadd.f32 %v2275_v38, %v738_v60 }
 0x1b8   : > { %1094 = vst [vmem:[%s2281_s7 + $0x20] sm:$0xff] %v1030_v57  ;;  %1126 = vst [vmem:[%s2281_s7 + $0x120] sm:$0xff] %v1062_v58 }
 0x1b9   : > { %1095 = vst [vmem:[%s2281_s7 + $0x28] sm:$0xff] %v1031_v61  ;;  %1127 = vst [vmem:[%s2281_s7 + $0x128] sm:$0xff] %v1063_v62  ;;  %v646_v63 = vpop.f32.mrb[6].mxu0  ;;  %v742_v0 = vpop.f32.mrb[6].mxu1 }
 0x1ba   : > { %v1032_v1 = vadd.f32 %v2273_v37, %v646_v63  ;;  %v1064_v2 = vadd.f32 %v2273_v37, %v742_v0  ;;  %v648_v3 = vpop.f32.mrb[7].mxu0  ;;  %v744_v4 = vpop.f32.mrb[7].mxu1 }
 0x1bb   : > { %v1033_v5 = vadd.f32 %v2275_v38, %v648_v3  ;;  %v1065_v6 = vadd.f32 %v2275_v38, %v744_v4 }
 0x1bc   : > { %1096 = vst [vmem:[%s2281_s7 + $0x30] sm:$0xff] %v1032_v1  ;;  %1128 = vst [vmem:[%s2281_s7 + $0x130] sm:$0xff] %v1064_v2 }
 0x1bd   : > { %1097 = vst [vmem:[%s2281_s7 + $0x38] sm:$0xff] %v1033_v5  ;;  %1129 = vst [vmem:[%s2281_s7 + $0x138] sm:$0xff] %v1065_v6  ;;  %v652_v7 = vpop.f32.mrb[8].mxu0  ;;  %v748_v8 = vpop.f32.mrb[8].mxu1 }
 0x1be   : > { %v1034_v9 = vadd.f32 %v2273_v37, %v652_v7  ;;  %v1066_v10 = vadd.f32 %v2273_v37, %v748_v8  ;;  %v654_v11 = vpop.f32.mrb[9].mxu0  ;;  %v750_v12 = vpop.f32.mrb[9].mxu1 }
 0x1bf   : > { %v1035_v13 = vadd.f32 %v2275_v38, %v654_v11  ;;  %v1067_v14 = vadd.f32 %v2275_v38, %v750_v12 }
 0x1c0   : > { %1098 = vst [vmem:[%s2281_s7 + $0x40] sm:$0xff] %v1034_v9  ;;  %1130 = vst [vmem:[%s2281_s7 + $0x140] sm:$0xff] %v1066_v10 }
 0x1c1   : > { %1099 = vst [vmem:[%s2281_s7 + $0x48] sm:$0xff] %v1035_v13  ;;  %1131 = vst [vmem:[%s2281_s7 + $0x148] sm:$0xff] %v1067_v14  ;;  %v658_v15 = vpop.f32.mrb[10].mxu0  ;;  %v754_v16 = vpop.f32.mrb[10].mxu1 }
 0x1c2   : > { %v1036_v17 = vadd.f32 %v2273_v37, %v658_v15  ;;  %v1068_v18 = vadd.f32 %v2273_v37, %v754_v16  ;;  %v660_v19 = vpop.f32.mrb[11].mxu0  ;;  %v756_v20 = vpop.f32.mrb[11].mxu1 }
 0x1c3   : > { %v1037_v21 = vadd.f32 %v2275_v38, %v660_v19  ;;  %v1069_v22 = vadd.f32 %v2275_v38, %v756_v20 }
 0x1c4   : > { %1100 = vst [vmem:[%s2281_s7 + $0x50] sm:$0xff] %v1036_v17  ;;  %1132 = vst [vmem:[%s2281_s7 + $0x150] sm:$0xff] %v1068_v18 }
 0x1c5   : > { %1101 = vst [vmem:[%s2281_s7 + $0x58] sm:$0xff] %v1037_v21  ;;  %1133 = vst [vmem:[%s2281_s7 + $0x158] sm:$0xff] %v1069_v22  ;;  %v664_v23 = vpop.f32.mrb[12].mxu0  ;;  %v760_v24 = vpop.f32.mrb[12].mxu1 }
 0x1c6   : > { %v1038_v25 = vadd.f32 %v2273_v37, %v664_v23  ;;  %v1070_v26 = vadd.f32 %v2273_v37, %v760_v24  ;;  %v666_v27 = vpop.f32.mrb[13].mxu0  ;;  %v762_v28 = vpop.f32.mrb[13].mxu1 }
 0x1c7   : > { %v1039_v29 = vadd.f32 %v2275_v38, %v666_v27  ;;  %v1071_v30 = vadd.f32 %v2275_v38, %v762_v28 }
 0x1c8   : > { %1102 = vst [vmem:[%s2281_s7 + $0x60] sm:$0xff] %v1038_v25  ;;  %1134 = vst [vmem:[%s2281_s7 + $0x160] sm:$0xff] %v1070_v26 }
 0x1c9   : > { %1103 = vst [vmem:[%s2281_s7 + $0x68] sm:$0xff] %v1039_v29  ;;  %1135 = vst [vmem:[%s2281_s7 + $0x168] sm:$0xff] %v1071_v30  ;;  %v670_v31 = vpop.f32.mrb[14].mxu0  ;;  %v766_v32 = vpop.f32.mrb[14].mxu1 }
 0x1ca   : > { %v1040_v33 = vadd.f32 %v2273_v37, %v670_v31  ;;  %v1072_v34 = vadd.f32 %v2273_v37, %v766_v32  ;;  %v672_v35 = vpop.f32.mrb[15].mxu0  ;;  %v768_v36 = vpop.f32.mrb[15].mxu1 }
 0x1cb   : > { %v1041_v39 = vadd.f32 %v2275_v38, %v672_v35  ;;  %v1073_v40 = vadd.f32 %v2275_v38, %v768_v36 }
 0x1cc   : > { %1104 = vst [vmem:[%s2281_s7 + $0x70] sm:$0xff] %v1040_v33  ;;  %1136 = vst [vmem:[%s2281_s7 + $0x170] sm:$0xff] %v1072_v34 }
 0x1cd   : > { %1105 = vst [vmem:[%s2281_s7 + $0x78] sm:$0xff] %v1041_v39  ;;  %1137 = vst [vmem:[%s2281_s7 + $0x178] sm:$0xff] %v1073_v40  ;;  %v676_v41 = vpop.f32.mrb[16].mxu0  ;;  %v772_v42 = vpop.f32.mrb[16].mxu1 }
 0x1ce   : > { %v1042_v43 = vadd.f32 %v2273_v37, %v676_v41  ;;  %v1074_v44 = vadd.f32 %v2273_v37, %v772_v42  ;;  %v678_v45 = vpop.f32.mrb[17].mxu0  ;;  %v774_v46 = vpop.f32.mrb[17].mxu1 }
 0x1cf   : > { %v1043_v47 = vadd.f32 %v2275_v38, %v678_v45  ;;  %v1075_v48 = vadd.f32 %v2275_v38, %v774_v46 }
 0x1d0   : > { %1106 = vst [vmem:[%s2281_s7 + $0x80] sm:$0xff] %v1042_v43  ;;  %1138 = vst [vmem:[%s2281_s7 + $0x180] sm:$0xff] %v1074_v44 }
 0x1d1   : > { %1107 = vst [vmem:[%s2281_s7 + $0x88] sm:$0xff] %v1043_v47  ;;  %1139 = vst [vmem:[%s2281_s7 + $0x188] sm:$0xff] %v1075_v48  ;;  %v682_v49 = vpop.f32.mrb[18].mxu0  ;;  %v778_v50 = vpop.f32.mrb[18].mxu1 }
 0x1d2   : > { %v1044_v51 = vadd.f32 %v2273_v37, %v682_v49  ;;  %v1076_v52 = vadd.f32 %v2273_v37, %v778_v50  ;;  %v684_v53 = vpop.f32.mrb[19].mxu0  ;;  %v780_v54 = vpop.f32.mrb[19].mxu1 }
 0x1d3   : > { %v1045_v55 = vadd.f32 %v2275_v38, %v684_v53  ;;  %v1077_v56 = vadd.f32 %v2275_v38, %v780_v54 }
 0x1d4   : > { %1108 = vst [vmem:[%s2281_s7 + $0x90] sm:$0xff] %v1044_v51  ;;  %1140 = vst [vmem:[%s2281_s7 + $0x190] sm:$0xff] %v1076_v52 }
 0x1d5   : > { %1109 = vst [vmem:[%s2281_s7 + $0x98] sm:$0xff] %v1045_v55  ;;  %1141 = vst [vmem:[%s2281_s7 + $0x198] sm:$0xff] %v1077_v56  ;;  %v688_v57 = vpop.f32.mrb[20].mxu0  ;;  %v784_v58 = vpop.f32.mrb[20].mxu1 }
 0x1d6   : > { %v1046_v59 = vadd.f32 %v2273_v37, %v688_v57  ;;  %v1078_v60 = vadd.f32 %v2273_v37, %v784_v58  ;;  %v690_v61 = vpop.f32.mrb[21].mxu0  ;;  %v786_v62 = vpop.f32.mrb[21].mxu1 }
 0x1d7   : > { %v1047_v63 = vadd.f32 %v2275_v38, %v690_v61  ;;  %v1079_v0 = vadd.f32 %v2275_v38, %v786_v62 }
 0x1d8   : > { %1110 = vst [vmem:[%s2281_s7 + $0xa0] sm:$0xff] %v1046_v59  ;;  %1142 = vst [vmem:[%s2281_s7 + $0x1a0] sm:$0xff] %v1078_v60 }
 0x1d9   : > { %1111 = vst [vmem:[%s2281_s7 + $0xa8] sm:$0xff] %v1047_v63  ;;  %1143 = vst [vmem:[%s2281_s7 + $0x1a8] sm:$0xff] %v1079_v0  ;;  %v694_v1 = vpop.f32.mrb[22].mxu0  ;;  %v790_v2 = vpop.f32.mrb[22].mxu1 }
 0x1da   : > { %v1048_v3 = vadd.f32 %v2273_v37, %v694_v1  ;;  %v1080_v4 = vadd.f32 %v2273_v37, %v790_v2  ;;  %v696_v5 = vpop.f32.mrb[23].mxu0  ;;  %v792_v6 = vpop.f32.mrb[23].mxu1 }
 0x1db   : > { %v1049_v7 = vadd.f32 %v2275_v38, %v696_v5  ;;  %v1081_v8 = vadd.f32 %v2275_v38, %v792_v6 }
 0x1dc   : > { %1112 = vst [vmem:[%s2281_s7 + $0xb0] sm:$0xff] %v1048_v3  ;;  %1144 = vst [vmem:[%s2281_s7 + $0x1b0] sm:$0xff] %v1080_v4 }
 0x1dd   : > { %1113 = vst [vmem:[%s2281_s7 + $0xb8] sm:$0xff] %v1049_v7  ;;  %1145 = vst [vmem:[%s2281_s7 + $0x1b8] sm:$0xff] %v1081_v8  ;;  %v700_v9 = vpop.f32.mrb[24].mxu0  ;;  %v796_v10 = vpop.f32.mrb[24].mxu1 }
 0x1de   : > { %v1050_v11 = vadd.f32 %v2273_v37, %v700_v9  ;;  %v1082_v12 = vadd.f32 %v2273_v37, %v796_v10  ;;  %v702_v13 = vpop.f32.mrb[25].mxu0  ;;  %v798_v14 = vpop.f32.mrb[25].mxu1 }
 0x1df   : > { %v1051_v15 = vadd.f32 %v2275_v38, %v702_v13  ;;  %v1083_v16 = vadd.f32 %v2275_v38, %v798_v14 }
 0x1e0   : > { %1114 = vst [vmem:[%s2281_s7 + $0xc0] sm:$0xff] %v1050_v11  ;;  %1146 = vst [vmem:[%s2281_s7 + $0x1c0] sm:$0xff] %v1082_v12 }
 0x1e1   : > { %1115 = vst [vmem:[%s2281_s7 + $0xc8] sm:$0xff] %v1051_v15  ;;  %1147 = vst [vmem:[%s2281_s7 + $0x1c8] sm:$0xff] %v1083_v16  ;;  %v706_v17 = vpop.f32.mrb[26].mxu0  ;;  %v802_v18 = vpop.f32.mrb[26].mxu1 }
 0x1e2   : > { %v1052_v19 = vadd.f32 %v2273_v37, %v706_v17  ;;  %v1084_v20 = vadd.f32 %v2273_v37, %v802_v18  ;;  %v708_v21 = vpop.f32.mrb[27].mxu0  ;;  %v804_v22 = vpop.f32.mrb[27].mxu1 }
 0x1e3   : > { %v1053_v23 = vadd.f32 %v2275_v38, %v708_v21  ;;  %v1085_v24 = vadd.f32 %v2275_v38, %v804_v22 }
 0x1e4   : > { %1116 = vst [vmem:[%s2281_s7 + $0xd0] sm:$0xff] %v1052_v19  ;;  %1148 = vst [vmem:[%s2281_s7 + $0x1d0] sm:$0xff] %v1084_v20 }
 0x1e5   : > { %1117 = vst [vmem:[%s2281_s7 + $0xd8] sm:$0xff] %v1053_v23  ;;  %1149 = vst [vmem:[%s2281_s7 + $0x1d8] sm:$0xff] %v1085_v24  ;;  %v712_v25 = vpop.f32.mrb[28].mxu0  ;;  %v808_v26 = vpop.f32.mrb[28].mxu1 }
 0x1e6   : > { %v1054_v27 = vadd.f32 %v2273_v37, %v712_v25  ;;  %v1086_v28 = vadd.f32 %v2273_v37, %v808_v26  ;;  %v714_v29 = vpop.f32.mrb[29].mxu0  ;;  %v810_v30 = vpop.f32.mrb[29].mxu1 }
 0x1e7   : > { %v1055_v31 = vadd.f32 %v2275_v38, %v714_v29  ;;  %v1087_v32 = vadd.f32 %v2275_v38, %v810_v30 }
 0x1e8   : > { %1118 = vst [vmem:[%s2281_s7 + $0xe0] sm:$0xff] %v1054_v27  ;;  %1150 = vst [vmem:[%s2281_s7 + $0x1e0] sm:$0xff] %v1086_v28 }
 0x1e9   : > { %1119 = vst [vmem:[%s2281_s7 + $0xe8] sm:$0xff] %v1055_v31  ;;  %1151 = vst [vmem:[%s2281_s7 + $0x1e8] sm:$0xff] %v1087_v32  ;;  %v718_v33 = vpop.f32.mrb[30].mxu0  ;;  %v814_v34 = vpop.f32.mrb[30].mxu1 }
 0x1ea   : > { %v1056_v35 = vadd.f32 %v2273_v37, %v718_v33  ;;  %v1088_v36 = vadd.f32 %v2273_v37, %v814_v34  ;;  %v720_v39 = vpop.f32.mrb[31].mxu0  ;;  %v816_v40 = vpop.f32.mrb[31].mxu1 }
 0x1eb   : > { %v1057_v41 = vadd.f32 %v2275_v38, %v720_v39  ;;  %v1089_v42 = vadd.f32 %v2275_v38, %v816_v40 }
 0x1ec   : > { %1120 = vst [vmem:[%s2281_s7 + $0xf0] sm:$0xff] %v1056_v35  ;;  %1152 = vst [vmem:[%s2281_s7 + $0x1f0] sm:$0xff] %v1088_v36 }
 0x1ed   : > { %1121 = vst [vmem:[%s2281_s7 + $0xf8] sm:$0xff] %v1057_v41  ;;  %1153 = vst [vmem:[%s2281_s7 + $0x1f8] sm:$0xff] %v1089_v42 }
 0x1ee   : > { %1682 = shalt.err (!%p1679_p2)
}
 0x1ef   : > { %s1683_s27 = scalar_lea.hbm %s2405_s0, 8192  ;;  %s1687_s1 = scalar_lea.hbm %s2556_s6, 49152 }
 0x1f0   : > { %p1684_p12 = scmp.ne.s32.totalorder %s2405_s0, %s1683_s27  ;;  %p1688_p3 = scmp.lt.u32.totalorder %s2405_s0, %s2556_s6 }
 0x1f1   : > { %p1689_p4 = scmp.lt.u32.totalorder %s1687_s1, %s1683_s27  ;;  %p1691_p13 = scmp.lt.u32.totalorder %s1683_s27, %s2405_s0 }
 0x1f2   : > { %p1685_p0 = pnand %p1684_p12, %p2557_p10 }
 0x1f3   : > { %p1690_p5 = por %p1689_p4, %p1688_p3 }
 0x1f4   : > { %p1686_p6 = pneg %p1685_p0 }
 0x1f5   : > { %p1692_p1 = por %p1691_p13, %p1690_p5 }
 0x1f7   : > { %p1693_p7 = pnand %p1692_p1, %p1686_p6 }
 0x1f9   : > { %1696 = shalt.err (!%p1693_p7)
}
 0x1fa   : > { %s1828_s30 = smov 256   ;;  %s1829_s7 = smov 768  }
 0x1fb   : > { %s1830_s8 = smov 16  }
 0x1fc   : > { %1443 = dma.vmem_to_hbm [thread:$0]  (%p2557_p10), %s2409_s5, 8192, %s2405_s0, %s2419_s12, %s1828_s30, %s1829_s7, %s1830_s8  }
 0x1fd PF: > { %s2558_s23 = sld [smem:[#allocation13_spill]]  ;;  %s2559_s14 = sld [smem:[#allocation24_spill]] }
 0x1fe   : > { %p1460_p9 = scmp.ge.s32.totalorder %s1819_s25, 2 }
 0x203   : > { %s1186_s21 = sand.u32 1, %s2558_s23   ;;  %p2560_p11 = scmp.ne.s32.totalorder %s2559_s14, 0 }
 0x204   : > { %s1187_s26 = scalar_lea.sflag [#allocation5], %s1186_s21 }
 0x205   : > { %p1456_p8 = pnand %p1460_p9, %p2560_p11 }
 0x207   : > { %1762 = dma.done.wait (!%p1456_p8), %s1187_s26, 8192  }
 0x208   : > { %1764 = vsyncadd (!%p1456_p8), %s1187_s26, 4294959104  ;;  %s22_s25 = sadd.s32 1, %s1819_s25   ;;  %s2562_s15 = sld [smem:[#allocation14_spill]] }
 0x209   : > { %p2448_p2 = scmp.ge.s32.totalorder %s22_s25, 8   ;;  %s2563_s14 = sld [smem:[#allocation23_spill]] }
 0x20a   : > { %s2564_s5 = sld [smem:[#allocation15_spill]]  ;;  %s2565_s17 = sld [smem:[#allocation22_spill]] }
 0x20b   : > { %s2566_s22 = sld [smem:[#allocation16_spill]]  ;;  %s2567_s20 = sld [smem:[#allocation21_spill]] }
 0x20c   : > { %s2568_s21 = sld [smem:[#allocation18_spill]]  ;;  %s2569_s23 = sld [smem:[#allocation19_spill]] }
 0x20d   : > { %s2570_s0 = sld [smem:[#allocation20_spill]]  ;;  %s2572_s12 = smov %s1771_s13 }
 0x20e   : > { %s2573_s13 = smov %s2562_s15  ;;  %s2574_s15 = smov %s1783_s16 }
 0x20f   : > { %s2576_s18 = smov %s1795_s19  ;;  %21 = sbr.rel (!%p2448_p2) target bundleno = 16 (0x10), region = 109 }
 0x210   : > { %s2575_s16 = smov %s2564_s5 }
 0x211   : > { %s2577_s19 = smov %s2566_s22  ;;  %s2578_s22 = smov %s1815_s24 }
 0x213   : > { %s2579_s24 = smov %s2570_s0 }
 0x216   :  { %1192 = vsyncpa [#allocation4], 1 }
 0x217   :  { %1194 = vsyncpa [#allocation4 + $0x1], 1 }
 0x218   :  { %1195 = vsyncpa [#allocation7], 1 }
 0x219   :  { %1197 = vsyncpa [#allocation7 + $0x1], 1 }
 0x21a   :  { %1198 = vsyncpa [#allocation5], 1 }
 0x21b   :  { %1200 = vsyncpa [#allocation5 + $0x1], 1 }

</bundles_post_ra>
